<compile_context>
chip_gen: v6e
topology: v6e:2x2x1
jax: 0.10.0
libtpu: 0.0.40
codegen_flags: <defaults>
</compile_context>

<pallas_src>
import jax
import jax.numpy as jnp
from jax.experimental import pallas as pl
from jax.experimental.pallas import tpu as pltpu


def mask_decoder_kernel(
    src_ref,    # (1, C, HW)      image embedding, (C, HW) layout, per image b
    pos_ref,    # (1, C, HW)      positional encoding (shared, constant block)
    tok_ref,    # (1, 1, N, C)    prompt tokens for (b, p)
    w_img_ref,  # (2C, C) f32     [Wk1^T ; Wq2^T]
    wv1t_ref,   # (C, C)  f32     Wv1^T
    wq1_ref,    # (C, C)  f32
    wo1_ref,    # (C, C)  f32
    wm1_ref,    # (C, 4C) f32
    wm2_ref,    # (4C, C) f32
    w_tok_ref,  # (C, 2C) f32     [Wk2 | Wv2]
    wo2t_ref,   # (C, C)  f32     Wo2^T
    out_ref,    # (1, 1, C, HW)
    kq_scr,     # VMEM (2C, HW) f32   rows [0:C]=k^T, [C:2C]=q2^T  (per image)
    v1_scr,     # VMEM (HW, C)  f32   v = src @ Wv1                (per image)
):
    p = pl.program_id(1)
    C = src_ref.shape[1]
    HW = src_ref.shape[2]
    scale = C ** -0.5

    # ---- image-side work: only once per image (p == 0), cached in scratch ----
    @pl.when(p == 0)
    def _():
        s_t = src_ref[0]                                            # (C, HW)
        sp_t = s_t + pos_ref[0]                                     # (C, HW)
        # fused [k^T ; q2^T] = [Wk1^T ; Wq2^T] @ (src + pos)^T  -> lane-dense
        kq_scr[...] = jnp.dot(w_img_ref[...], sp_t,
                              preferred_element_type=jnp.float32)   # (2C, HW)
        v_t = jnp.dot(wv1t_ref[...], s_t,
                      preferred_element_type=jnp.float32)           # (C, HW)
        v1_scr[...] = v_t.T                                         # (HW, C)

    k_t = kq_scr[0:C, :]        # (C, HW)
    q2_t = kq_scr[C:2 * C, :]   # (C, HW)

    tok = tok_ref[0, 0]                                             # (N, C)

    # ---- cross attention: tokens attend to image ----
    q = jnp.dot(tok, wq1_ref[...],
                preferred_element_type=jnp.float32)                 # (N, C)
    logits = jnp.dot(q, k_t,
                     preferred_element_type=jnp.float32) * scale    # (N, HW)
    m1 = jnp.max(logits, axis=-1, keepdims=True)
    e1 = jnp.exp(logits - m1)
    a1 = e1 / jnp.sum(e1, axis=-1, keepdims=True)
    attn_out = jnp.dot(a1, v1_scr[...],
                       preferred_element_type=jnp.float32)          # (N, C)
    tok = tok + jnp.dot(attn_out, wo1_ref[...],
                        preferred_element_type=jnp.float32)

    # ---- MLP on tokens ----
    h = jnp.maximum(
        jnp.dot(tok, wm1_ref[...],
                preferred_element_type=jnp.float32), 0.0)           # (N, 4C)
    tok = tok + jnp.dot(h, wm2_ref[...],
                        preferred_element_type=jnp.float32)

    # ---- cross attention: image attends to tokens ----
    kv2 = jnp.dot(tok, w_tok_ref[...],
                  preferred_element_type=jnp.float32)               # (N, 2C)
    k2 = kv2[:, 0:C]                                                # (N, C)
    v2 = kv2[:, C:2 * C]                                            # (N, C)
    # logits2^T = k2 @ q2^T  -> (N, HW); softmax over the token axis (axis=0)
    logits2_t = jnp.dot(k2, q2_t,
                        preferred_element_type=jnp.float32) * scale
    m2 = jnp.max(logits2_t, axis=0, keepdims=True)
    e2 = jnp.exp(logits2_t - m2)
    a2_t = e2 / jnp.sum(e2, axis=0, keepdims=True)
    # (attn2 @ v2)^T = v2^T @ attn2^T : (C, N) @ (N, HW) -> (C, HW)
    out_t = jnp.dot(v2.T, a2_t, preferred_element_type=jnp.float32)
    # ((attn2 @ v2) @ Wo2)^T = Wo2^T @ out_t : (C, HW)  (lane-dense)
    upd_t = jnp.dot(wo2t_ref[...], out_t, preferred_element_type=jnp.float32)
    out_ref[0, 0] = (src_ref[0] + upd_t).astype(out_ref.dtype)


def make_params(C, key):
    """Deterministic transformer parameters (shapes implied by a SAM-style block)."""
    ks = jax.random.split(key, 10)
    s = 0.05
    return dict(
        wq1=s * jax.random.normal(ks[0], (C, C), jnp.float32),
        wk1=s * jax.random.normal(ks[1], (C, C), jnp.float32),
        wv1=s * jax.random.normal(ks[2], (C, C), jnp.float32),
        wo1=s * jax.random.normal(ks[3], (C, C), jnp.float32),
        wm1=s * jax.random.normal(ks[4], (C, 4 * C), jnp.float32),
        wm2=s * jax.random.normal(ks[5], (4 * C, C), jnp.float32),
        wq2=s * jax.random.normal(ks[6], (C, C), jnp.float32),
        wk2=s * jax.random.normal(ks[7], (C, C), jnp.float32),
        wv2=s * jax.random.normal(ks[8], (C, C), jnp.float32),
        wo2=s * jax.random.normal(ks[9], (C, C), jnp.float32),
    )


def mask_decoder_forward(image_embeddings, image_pe, sparse_prompt_embeddings, params):
    """
    image_embeddings:         (B, C, H, W)    NCHW, as in the PyTorch module
    image_pe:                 (1, C, H, W)
    sparse_prompt_embeddings: (B, P, N, C)    P prompts per image, N tokens each
    returns:                  (B*P, C, H, W)
    """
    B, C, H, W = image_embeddings.shape
    P, N = sparse_prompt_embeddings.shape[1], sparse_prompt_embeddings.shape[2]
    HW = H * W

    # No jnp.repeat / broadcast_to: the index_maps do the per-prompt fan-out.
    src = image_embeddings.reshape(B, C, HW)       # (B, C, HW) lane-dense
    pos = image_pe.reshape(1, C, HW)               # (1, C, HW) single copy
    tokens = sparse_prompt_embeddings              # (B, P, N, C)

    f32 = jnp.float32
    w_img = jnp.concatenate([params["wk1"].T, params["wq2"].T], axis=0).astype(f32)
    wv1t = params["wv1"].T.astype(f32)
    wq1 = params["wq1"].astype(f32)
    wo1 = params["wo1"].astype(f32)
    wm1 = params["wm1"].astype(f32)
    wm2 = params["wm2"].astype(f32)
    w_tok = jnp.concatenate([params["wk2"], params["wv2"]], axis=1).astype(f32)
    wo2t = params["wo2"].T.astype(f32)
    weights = [w_img, wv1t, wq1, wo1, wm1, wm2, w_tok, wo2t]

    def wspec(w):
        return pl.BlockSpec(w.shape, lambda b, p: (0, 0))

    out = pl.pallas_call(
        mask_decoder_kernel,
        out_shape=jax.ShapeDtypeStruct((B, P, C, HW), jnp.float32),
        grid_spec=pltpu.PrefetchScalarGridSpec(
            num_scalar_prefetch=0,
            grid=(B, P),
            in_specs=[
                pl.BlockSpec((1, C, HW), lambda b, p: (b, 0, 0)),       # src (per image)
                pl.BlockSpec((1, C, HW), lambda b, p: (0, 0, 0)),       # pos (constant)
                pl.BlockSpec((1, 1, N, C), lambda b, p: (b, p, 0, 0)),  # tokens
            ] + [wspec(w) for w in weights],
            out_specs=pl.BlockSpec((1, 1, C, HW), lambda b, p: (b, p, 0, 0)),
            scratch_shapes=[
                pltpu.VMEM((2 * C, HW), jnp.float32),   # cached [k^T ; q2^T]
                pltpu.VMEM((HW, C), jnp.float32),       # cached v
            ],
        ),
        compiler_params=pltpu.CompilerParams(
            dimension_semantics=("parallel", "arbitrary"),
        ),
    )(src, pos, tokens, *weights)

    # (B, P, C, HW) -> (B*P, C, H, W): pure reshape, no transpose pass needed.
    return out.reshape(B * P, C, H, W)


def _reference_forward(image_embeddings, image_pe, sparse_prompt_embeddings, params):
    """Pure-JAX f32 reference of the same two-way transformer block."""
    B, C, H, W = image_embeddings.shape
    P, N = sparse_prompt_embeddings.shape[1], sparse_prompt_embeddings.shape[2]
    BP, HW = B * P, H * W
    src = jnp.repeat(image_embeddings, P, axis=0).reshape(BP, C, HW).transpose(0, 2, 1)
    pos = jnp.broadcast_to(image_pe, (BP, C, H, W)).reshape(BP, C, HW).transpose(0, 2, 1)
    tok = sparse_prompt_embeddings.reshape(BP, N, C)
    scale = C ** -0.5
    src_pe = src + pos

    q = tok @ params["wq1"]
    k = src_pe @ params["wk1"]
    v = src @ params["wv1"]
    attn = jax.nn.softmax((q @ k.transpose(0, 2, 1)) * scale, axis=-1)
    tok = tok + (attn @ v) @ params["wo1"]
    tok = tok + jax.nn.relu(tok @ params["wm1"]) @ params["wm2"]
    q2 = src_pe @ params["wq2"]
    k2 = tok @ params["wk2"]
    v2 = tok @ params["wv2"]
    attn2 = jax.nn.softmax((q2 @ k2.transpose(0, 2, 1)) * scale, axis=-1)
    src_out = src + (attn2 @ v2) @ params["wo2"]
    return src_out.transpose(0, 2, 1).reshape(BP, C, H, W)


if __name__ == "__main__":
    B, C, H, W = 2, 32, 16, 16   # batch, transformer_dim, spatial
    P, N = 2, 8                  # prompts per image, tokens per prompt

    key = jax.random.PRNGKey(0)
    k_img, k_pe, k_tok, k_par = jax.random.split(key, 4)

    image_embeddings = jax.random.normal(k_img, (B, C, H, W), jnp.float32)
    image_pe = jax.random.normal(k_pe, (1, C, H, W), jnp.float32)
    sparse_prompt_embeddings = jax.random.normal(k_tok, (B, P, N, C), jnp.float32)
    params = make_params(C, k_par)

    out = mask_decoder_forward(
        image_embeddings, image_pe, sparse_prompt_embeddings, params
    )
    out = jax.block_until_ready(out)

    ref = _reference_forward(
        image_embeddings, image_pe, sparse_prompt_embeddings, params
    )
    assert out.shape == (B * P, C, H, W), out.shape
    assert jnp.allclose(out, ref, rtol=2e-3, atol=2e-3), "mismatch vs reference"

    print("KERNEL_OK")
</pallas_src>

<mosaic_0001>
module attributes {stable_mosaic.version = 11 : i64} {
  func.func @mask_decoder_kernel(%arg0: i32, %arg1: i32, %arg2: memref<1x32x256xf32, #tpu.memory_space<vmem>>, %arg3: memref<1x32x256xf32, #tpu.memory_space<vmem>>, %arg4: memref<1x1x8x32xf32, #tpu.memory_space<vmem>>, %arg5: memref<64x32xf32, #tpu.memory_space<vmem>>, %arg6: memref<32x32xf32, #tpu.memory_space<vmem>>, %arg7: memref<32x32xf32, #tpu.memory_space<vmem>>, %arg8: memref<32x32xf32, #tpu.memory_space<vmem>>, %arg9: memref<32x128xf32, #tpu.memory_space<vmem>>, %arg10: memref<128x32xf32, #tpu.memory_space<vmem>>, %arg11: memref<32x64xf32, #tpu.memory_space<vmem>>, %arg12: memref<32x32xf32, #tpu.memory_space<vmem>>, %arg13: memref<1x1x32x256xf32, #tpu.memory_space<vmem>>, %arg14: memref<64x256xf32, #tpu.memory_space<vmem>>, %arg15: memref<256x32xf32, #tpu.memory_space<vmem>>) attributes {dimension_semantics = [#tpu.dimension_semantics<parallel>, #tpu.dimension_semantics<arbitrary>], iteration_bounds = array<i64: 2, 2>, scalar_prefetch = 0 : i64, scratch_operands = 2 : i64, tpu.core_type = #tpu.core_type<tc>, window_params = [{transform_indices = @transform_0, window_bounds = array<i64: 1, 32, 256>}, {pipeline_mode = #tpu.pipeline_mode<synchronous>, transform_indices = @transform_1, window_bounds = array<i64: 1, 32, 256>}, {transform_indices = @transform_2, window_bounds = array<i64: 1, 1, 8, 32>}, {pipeline_mode = #tpu.pipeline_mode<synchronous>, transform_indices = @transform_3, window_bounds = array<i64: 64, 32>}, {pipeline_mode = #tpu.pipeline_mode<synchronous>, transform_indices = @transform_4, window_bounds = array<i64: 32, 32>}, {pipeline_mode = #tpu.pipeline_mode<synchronous>, transform_indices = @transform_5, window_bounds = array<i64: 32, 32>}, {pipeline_mode = #tpu.pipeline_mode<synchronous>, transform_indices = @transform_6, window_bounds = array<i64: 32, 32>}, {pipeline_mode = #tpu.pipeline_mode<synchronous>, transform_indices = @transform_7, window_bounds = array<i64: 32, 128>}, {pipeline_mode = #tpu.pipeline_mode<synchronous>, transform_indices = @transform_8, window_bounds = array<i64: 128, 32>}, {pipeline_mode = #tpu.pipeline_mode<synchronous>, transform_indices = @transform_9, window_bounds = array<i64: 32, 64>}, {pipeline_mode = #tpu.pipeline_mode<synchronous>, transform_indices = @transform_10, window_bounds = array<i64: 32, 32>}, {transform_indices = @transform_11, window_bounds = array<i64: 1, 1, 32, 256>}]} {
    %c0_i32 = arith.constant 0 : i32
    %0 = arith.cmpi eq, %arg1, %c0_i32 : i32
    %1 = arith.extui %0 : i1 to i32
    %c0_i32_0 = arith.constant 0 : i32
    %2 = arith.cmpi ne, %1, %c0_i32_0 : i32
    scf.if %2 {
      %c0_44 = arith.constant 0 : index
      %c0_45 = arith.constant 0 : index
      %c0_46 = arith.constant 0 : index
      %59 = vector.load %arg2[%c0_44, %c0_45, %c0_46] : memref<1x32x256xf32, #tpu.memory_space<vmem>>, vector<1x32x256xf32>
      %60 = vector.shape_cast %59 : vector<1x32x256xf32> to vector<32x256xf32>
      %c0_47 = arith.constant 0 : index
      %c0_48 = arith.constant 0 : index
      %c0_49 = arith.constant 0 : index
      %61 = vector.load %arg3[%c0_47, %c0_48, %c0_49] : memref<1x32x256xf32, #tpu.memory_space<vmem>>, vector<1x32x256xf32>
      %62 = vector.shape_cast %61 : vector<1x32x256xf32> to vector<32x256xf32>
      %63 = arith.addf %60, %62 : vector<32x256xf32>
      %c0_50 = arith.constant 0 : index
      %c0_51 = arith.constant 0 : index
      %64 = vector.load %arg5[%c0_50, %c0_51] : memref<64x32xf32, #tpu.memory_space<vmem>>, vector<64x32xf32>
      %cst_52 = arith.constant dense<0.000000e+00> : vector<64x256xf32>
      %65 = tpu.matmul %64, %63, %cst_52 {dimension_numbers = #tpu.dot_dimension_numbers<[1], [0], [0], [1], [0, 0, 1, 1], [], []>} : vector<64x32xf32>, vector<32x256xf32>, vector<64x256xf32> -> vector<64x256xf32>
      %c0_53 = arith.constant 0 : index
      %c0_54 = arith.constant 0 : index
      %66 = vector.load %arg14[%c0_53, %c0_54] : memref<64x256xf32, #tpu.memory_space<vmem>>, vector<64x256xf32>
      tpu.vector_store %arg14[%c0_53, %c0_54], %65 {strides = array<i32>} : memref<64x256xf32, #tpu.memory_space<vmem>>, vector<64x256xf32>,
      %c0_55 = arith.constant 0 : index
      %c0_56 = arith.constant 0 : index
      %67 = vector.load %arg6[%c0_55, %c0_56] : memref<32x32xf32, #tpu.memory_space<vmem>>, vector<32x32xf32>
      %cst_57 = arith.constant dense<0.000000e+00> : vector<32x256xf32>
      %68 = tpu.matmul %67, %60, %cst_57 {dimension_numbers = #tpu.dot_dimension_numbers<[1], [0], [0], [1], [0, 0, 1, 1], [], []>} : vector<32x32xf32>, vector<32x256xf32>, vector<32x256xf32> -> vector<32x256xf32>
      %69 = tpu.transpose %68, [1, 0] : vector<32x256xf32> -> vector<256x32xf32>
      %c0_58 = arith.constant 0 : index
      %c0_59 = arith.constant 0 : index
      %70 = vector.load %arg15[%c0_58, %c0_59] : memref<256x32xf32, #tpu.memory_space<vmem>>, vector<256x32xf32>
      tpu.vector_store %arg15[%c0_58, %c0_59], %69 {strides = array<i32>} : memref<256x32xf32, #tpu.memory_space<vmem>>, vector<256x32xf32>,
    } else {
    }
    %c0 = arith.constant 0 : index
    %c0_1 = arith.constant 0 : index
    %3 = vector.load %arg14[%c0, %c0_1] : memref<64x256xf32, #tpu.memory_space<vmem>>, vector<32x256xf32>
    %c32 = arith.constant 32 : index
    %c0_2 = arith.constant 0 : index
    %4 = vector.load %arg14[%c32, %c0_2] : memref<64x256xf32, #tpu.memory_space<vmem>>, vector<32x256xf32>
    %c0_3 = arith.constant 0 : index
    %c0_4 = arith.constant 0 : index
    %c0_5 = arith.constant 0 : index
    %c0_6 = arith.constant 0 : index
    %5 = vector.load %arg4[%c0_3, %c0_4, %c0_5, %c0_6] : memref<1x1x8x32xf32, #tpu.memory_space<vmem>>, vector<1x1x8x32xf32>
    %6 = vector.shape_cast %5 : vector<1x1x8x32xf32> to vector<8x32xf32>
    %c0_7 = arith.constant 0 : index
    %c0_8 = arith.constant 0 : index
    %7 = vector.load %arg7[%c0_7, %c0_8] : memref<32x32xf32, #tpu.memory_space<vmem>>, vector<32x32xf32>
    %cst = arith.constant dense<0.000000e+00> : vector<8x32xf32>
    %8 = tpu.matmul %6, %7, %cst {dimension_numbers = #tpu.dot_dimension_numbers<[1], [0], [0], [1], [0, 0, 1, 1], [], []>} : vector<8x32xf32>, vector<32x32xf32>, vector<8x32xf32> -> vector<8x32xf32>
    %cst_9 = arith.constant dense<0.000000e+00> : vector<8x256xf32>
    %9 = tpu.matmul %8, %3, %cst_9 {dimension_numbers = #tpu.dot_dimension_numbers<[1], [0], [0], [1], [0, 0, 1, 1], [], []>} : vector<8x32xf32>, vector<32x256xf32>, vector<8x256xf32> -> vector<8x256xf32>
    %cst_10 = arith.constant 0.176776692 : f32
    %10 = vector.broadcast %cst_10 : f32 to vector<8x256xf32>
    %11 = arith.mulf %9, %10 : vector<8x256xf32>
    %cst_11 = arith.constant dense<0xFF800000> : vector<8xf32>
    %12 = vector.multi_reduction <maximumf>, %11, %cst_11 [1] : vector<8x256xf32> to vector<8xf32>
    %13 = vector.shape_cast %12 : vector<8xf32> to vector<8x1xf32>
    %14 = vector.broadcast %13 : vector<8x1xf32> to vector<8x256xf32>
    %15 = arith.subf %11, %14 : vector<8x256xf32>
    %16 = math.exp %15 : vector<8x256xf32>
    %cst_12 = arith.constant dense<0.000000e+00> : vector<8xf32>
    %17 = vector.multi_reduction <add>, %16, %cst_12 [1] : vector<8x256xf32> to vector<8xf32>
    %18 = vector.shape_cast %17 : vector<8xf32> to vector<8x1xf32>
    %19 = vector.broadcast %18 : vector<8x1xf32> to vector<8x256xf32>
    %20 = arith.divf %16, %19 : vector<8x256xf32>
    %c0_13 = arith.constant 0 : index
    %c0_14 = arith.constant 0 : index
    %21 = vector.load %arg15[%c0_13, %c0_14] : memref<256x32xf32, #tpu.memory_space<vmem>>, vector<256x32xf32>
    %cst_15 = arith.constant dense<0.000000e+00> : vector<8x32xf32>
    %22 = tpu.matmul %20, %21, %cst_15 {dimension_numbers = #tpu.dot_dimension_numbers<[1], [0], [0], [1], [0, 0, 1, 1], [], []>} : vector<8x256xf32>, vector<256x32xf32>, vector<8x32xf32> -> vector<8x32xf32>
    %c0_16 = arith.constant 0 : index
    %c0_17 = arith.constant 0 : index
    %23 = vector.load %arg8[%c0_16, %c0_17] : memref<32x32xf32, #tpu.memory_space<vmem>>, vector<32x32xf32>
    %cst_18 = arith.constant dense<0.000000e+00> : vector<8x32xf32>
    %24 = tpu.matmul %22, %23, %cst_18 {dimension_numbers = #tpu.dot_dimension_numbers<[1], [0], [0], [1], [0, 0, 1, 1], [], []>} : vector<8x32xf32>, vector<32x32xf32>, vector<8x32xf32> -> vector<8x32xf32>
    %25 = arith.addf %6, %24 : vector<8x32xf32>
    %c0_19 = arith.constant 0 : index
    %c0_20 = arith.constant 0 : index
    %26 = vector.load %arg9[%c0_19, %c0_20] : memref<32x128xf32, #tpu.memory_space<vmem>>, vector<32x128xf32>
    %cst_21 = arith.constant dense<0.000000e+00> : vector<8x128xf32>
    %27 = tpu.matmul %25, %26, %cst_21 {dimension_numbers = #tpu.dot_dimension_numbers<[1], [0], [0], [1], [0, 0, 1, 1], [], []>} : vector<8x32xf32>, vector<32x128xf32>, vector<8x128xf32> -> vector<8x128xf32>
    %cst_22 = arith.constant 0.000000e+00 : f32
    %28 = vector.broadcast %cst_22 : f32 to vector<8x128xf32>
    %29 = arith.maximumf %27, %28 : vector<8x128xf32>
    %c0_23 = arith.constant 0 : index
    %c0_24 = arith.constant 0 : index
    %30 = vector.load %arg10[%c0_23, %c0_24] : memref<128x32xf32, #tpu.memory_space<vmem>>, vector<128x32xf32>
    %cst_25 = arith.constant dense<0.000000e+00> : vector<8x32xf32>
    %31 = tpu.matmul %29, %30, %cst_25 {dimension_numbers = #tpu.dot_dimension_numbers<[1], [0], [0], [1], [0, 0, 1, 1], [], []>} : vector<8x128xf32>, vector<128x32xf32>, vector<8x32xf32> -> vector<8x32xf32>
    %32 = arith.addf %25, %31 : vector<8x32xf32>
    %c0_26 = arith.constant 0 : index
    %c0_27 = arith.constant 0 : index
    %33 = vector.load %arg11[%c0_26, %c0_27] : memref<32x64xf32, #tpu.memory_space<vmem>>, vector<32x64xf32>
    %cst_28 = arith.constant dense<0.000000e+00> : vector<8x64xf32>
    %34 = tpu.matmul %32, %33, %cst_28 {dimension_numbers = #tpu.dot_dimension_numbers<[1], [0], [0], [1], [0, 0, 1, 1], [], []>} : vector<8x32xf32>, vector<32x64xf32>, vector<8x64xf32> -> vector<8x64xf32>
    %35 = vector.extract_strided_slice %34 {offsets = [0, 0], sizes = [8, 32], strides = [1, 1]} : vector<8x64xf32> to vector<8x32xf32>
    %36 = vector.extract_strided_slice %34 {offsets = [0, 32], sizes = [8, 32], strides = [1, 1]} : vector<8x64xf32> to vector<8x32xf32>
    %cst_29 = arith.constant dense<0.000000e+00> : vector<8x256xf32>
    %37 = tpu.matmul %35, %4, %cst_29 {dimension_numbers = #tpu.dot_dimension_numbers<[1], [0], [0], [1], [0, 0, 1, 1], [], []>} : vector<8x32xf32>, vector<32x256xf32>, vector<8x256xf32> -> vector<8x256xf32>
    %cst_30 = arith.constant 0.176776692 : f32
    %38 = vector.broadcast %cst_30 : f32 to vector<8x256xf32>
    %39 = arith.mulf %37, %38 : vector<8x256xf32>
    %cst_31 = arith.constant dense<0xFF800000> : vector<256xf32>
    %40 = vector.multi_reduction <maximumf>, %39, %cst_31 [0] : vector<8x256xf32> to vector<256xf32>
    %41 = vector.shape_cast %40 : vector<256xf32> to vector<1x256xf32>
    %42 = vector.broadcast %41 : vector<1x256xf32> to vector<8x256xf32>
    %43 = arith.subf %39, %42 : vector<8x256xf32>
    %44 = math.exp %43 : vector<8x256xf32>
    %cst_32 = arith.constant dense<0.000000e+00> : vector<256xf32>
    %45 = vector.multi_reduction <add>, %44, %cst_32 [0] : vector<8x256xf32> to vector<256xf32>
    %46 = vector.shape_cast %45 : vector<256xf32> to vector<1x256xf32>
    %47 = vector.broadcast %46 : vector<1x256xf32> to vector<8x256xf32>
    %48 = arith.divf %44, %47 : vector<8x256xf32>
    %49 = tpu.transpose %36, [1, 0] : vector<8x32xf32> -> vector<32x8xf32>
    %cst_33 = arith.constant dense<0.000000e+00> : vector<32x256xf32>
    %50 = tpu.matmul %49, %48, %cst_33 {dimension_numbers = #tpu.dot_dimension_numbers<[1], [0], [0], [1], [0, 0, 1, 1], [], []>} : vector<32x8xf32>, vector<8x256xf32>, vector<32x256xf32> -> vector<32x256xf32>
    %c0_34 = arith.constant 0 : index
    %c0_35 = arith.constant 0 : index
    %51 = vector.load %arg12[%c0_34, %c0_35] : memref<32x32xf32, #tpu.memory_space<vmem>>, vector<32x32xf32>
    %cst_36 = arith.constant dense<0.000000e+00> : vector<32x256xf32>
    %52 = tpu.matmul %51, %50, %cst_36 {dimension_numbers = #tpu.dot_dimension_numbers<[1], [0], [0], [1], [0, 0, 1, 1], [], []>} : vector<32x32xf32>, vector<32x256xf32>, vector<32x256xf32> -> vector<32x256xf32>
    %c0_37 = arith.constant 0 : index
    %c0_38 = arith.constant 0 : index
    %c0_39 = arith.constant 0 : index
    %53 = vector.load %arg2[%c0_37, %c0_38, %c0_39] : memref<1x32x256xf32, #tpu.memory_space<vmem>>, vector<1x32x256xf32>
    %54 = vector.shape_cast %53 : vector<1x32x256xf32> to vector<32x256xf32>
    %55 = arith.addf %54, %52 : vector<32x256xf32>
    %c0_40 = arith.constant 0 : index
    %c0_41 = arith.constant 0 : index
    %c0_42 = arith.constant 0 : index
    %c0_43 = arith.constant 0 : index
    %56 = vector.load %arg13[%c0_40, %c0_41, %c0_42, %c0_43] : memref<1x1x32x256xf32, #tpu.memory_space<vmem>>, vector<1x1x32x256xf32>
    %57 = vector.shape_cast %56 : vector<1x1x32x256xf32> to vector<32x256xf32>
    %58 = vector.shape_cast %55 : vector<32x256xf32> to vector<1x1x32x256xf32>
    tpu.vector_store %arg13[%c0_40, %c0_41, %c0_42, %c0_43], %58 {strides = array<i32>} : memref<1x1x32x256xf32, #tpu.memory_space<vmem>>, vector<1x1x32x256xf32>,
    return
  }
  func.func @transform_0(%arg0: i32, %arg1: i32) -> (i32, i32, i32) {
    %c0_i32 = arith.constant 0 : i32
    %c0_i32_0 = arith.constant 0 : i32
    %c0_i32_1 = arith.constant 0 : i32
    return %arg0, %c0_i32, %c0_i32_0 : i32, i32, i32
  }
  func.func @transform_1(%arg0: i32, %arg1: i32) -> (i32, i32, i32) {
    %c0_i32 = arith.constant 0 : i32
    %c0_i32_0 = arith.constant 0 : i32
    %c0_i32_1 = arith.constant 0 : i32
    %c0_i32_2 = arith.constant 0 : i32
    return %c0_i32, %c0_i32_0, %c0_i32_1 : i32, i32, i32
  }
  func.func @transform_2(%arg0: i32, %arg1: i32) -> (i32, i32, i32, i32) {
    %c0_i32 = arith.constant 0 : i32
    %c0_i32_0 = arith.constant 0 : i32
    %c0_i32_1 = arith.constant 0 : i32
    return %arg0, %arg1, %c0_i32, %c0_i32_0 : i32, i32, i32, i32
  }
  func.func @transform_3(%arg0: i32, %arg1: i32) -> (i32, i32) {
    %c0_i32 = arith.constant 0 : i32
    %c0_i32_0 = arith.constant 0 : i32
    %c0_i32_1 = arith.constant 0 : i32
    return %c0_i32, %c0_i32_0 : i32, i32
  }
  func.func @transform_4(%arg0: i32, %arg1: i32) -> (i32, i32) {
    %c0_i32 = arith.constant 0 : i32
    %c0_i32_0 = arith.constant 0 : i32
    %c0_i32_1 = arith.constant 0 : i32
    return %c0_i32, %c0_i32_0 : i32, i32
  }
  func.func @transform_5(%arg0: i32, %arg1: i32) -> (i32, i32) {
    %c0_i32 = arith.constant 0 : i32
    %c0_i32_0 = arith.constant 0 : i32
    %c0_i32_1 = arith.constant 0 : i32
    return %c0_i32, %c0_i32_0 : i32, i32
  }
  func.func @transform_6(%arg0: i32, %arg1: i32) -> (i32, i32) {
    %c0_i32 = arith.constant 0 : i32
    %c0_i32_0 = arith.constant 0 : i32
    %c0_i32_1 = arith.constant 0 : i32
    return %c0_i32, %c0_i32_0 : i32, i32
  }
  func.func @transform_7(%arg0: i32, %arg1: i32) -> (i32, i32) {
    %c0_i32 = arith.constant 0 : i32
    %c0_i32_0 = arith.constant 0 : i32
    %c0_i32_1 = arith.constant 0 : i32
    return %c0_i32, %c0_i32_0 : i32, i32
  }
  func.func @transform_8(%arg0: i32, %arg1: i32) -> (i32, i32) {
    %c0_i32 = arith.constant 0 : i32
    %c0_i32_0 = arith.constant 0 : i32
    %c0_i32_1 = arith.constant 0 : i32
    return %c0_i32, %c0_i32_0 : i32, i32
  }
  func.func @transform_9(%arg0: i32, %arg1: i32) -> (i32, i32) {
    %c0_i32 = arith.constant 0 : i32
    %c0_i32_0 = arith.constant 0 : i32
    %c0_i32_1 = arith.constant 0 : i32
    return %c0_i32, %c0_i32_0 : i32, i32
  }
  func.func @transform_10(%arg0: i32, %arg1: i32) -> (i32, i32) {
    %c0_i32 = arith.constant 0 : i32
    %c0_i32_0 = arith.constant 0 : i32
    %c0_i32_1 = arith.constant 0 : i32
    return %c0_i32, %c0_i32_0 : i32, i32
  }
  func.func @transform_11(%arg0: i32, %arg1: i32) -> (i32, i32, i32, i32) {
    %c0_i32 = arith.constant 0 : i32
    %c0_i32_0 = arith.constant 0 : i32
    %c0_i32_1 = arith.constant 0 : i32
    return %arg0, %arg1, %c0_i32, %c0_i32_0 : i32, i32, i32, i32
  }
}

</mosaic_0001>

<bundles_post_ra>
// kernel: tpu_custom_call.1
= control target key start
LH: loop header
LB: loop body
LE: loop exit
PB: predicated region body
PF: predicated region fallthrough
CT: control target
= control target key end

     0   :  { %s3274_s0 = inlined_call_operand.vmem [shape: f32[2,32,256], index: 0, kind: input, shape index: {}]   ;;  %s3275_s1 = inlined_call_operand.vmem [shape: f32[1,32,256], index: 1, kind: input, shape index: {}]   ;;  %s3276_s2 = inlined_call_operand.vmem [shape: f32[2,2,8,32], index: 2, kind: input, shape index: {}]   ;;  %s3277_s3 = inlined_call_operand.vmem [shape: f32[64,32], index: 3, kind: input, shape index: {}]   ;;  %s3278_s4 = inlined_call_operand.hbm [shape: f32[32,32], index: 4, kind: input, shape index: {}]   ;;  %s3279_s5 = inlined_call_operand.hbm [shape: f32[32,32], index: 5, kind: input, shape index: {}]   ;;  %s3280_s6 = inlined_call_operand.hbm [shape: f32[32,32], index: 6, kind: input, shape index: {}]   ;;  %s3281_s7 = inlined_call_operand.hbm [shape: f32[32,128], index: 7, kind: input, shape index: {}]   ;;  %s3282_s8 = inlined_call_operand.vmem [shape: f32[128,32], index: 8, kind: input, shape index: {}]   ;;  %s3283_s9 = inlined_call_operand.hbm [shape: f32[32,64], index: 9, kind: input, shape index: {}]   ;;  %s3284_s10 = inlined_call_operand.hbm [shape: f32[32,32], index: 10, kind: input, shape index: {}]   ;;  %s3285_s11 = inlined_call_operand.hbm [shape: f32[2,2,32,256], index: 11, kind: output, shape index: {}]  }
   0x1   :  { %3293 = sst [smem:[#allocation29_spill]] %s3279_s5 }
   0x2   :  { %16 = vsyncpa [#allocation5], 0 }
   0x3   :  { %17 = vsyncpa [#allocation8], 0 }
   0x4   :  { %18 = vsyncpa [#allocation11], 0 }
   0x5   :  { %19 = vsyncpa [#allocation14], 0 }
   0x6   :  { %20 = vsyncpa [#allocation6], 0 }
   0x7   :  { %22 = vsyncpa [#allocation6 + $0x1], 0  ;;  %s2773_s17 = smov 0   ;;  %s2775_s18 = smov 0  }
   0x8   :  { %s2777_s19 = smov 0   ;;  %s2779_s20 = smov 0  }
   0x9   :  { %s2781_s21 = smov 0   ;;  %s2783_s22 = smov 0  }
   0xa   :  { %s2785_s23 = smov 0   ;;  %s2787_s24 = smov 0  }
   0xb LB: > { %3294 = sst [smem:[#allocation21_spill]] %s2668_s17  ;;  %s2063_s25 = sadd.s32 4294967295, %s2696_s24   ;;  %s2696_s24 = sphi %s2787_s24, %s28_s24   ;;  %s2692_s23 = sphi %s2785_s23, %s3317_s23   ;;  %s2688_s22 = sphi %s2783_s22, %s3316_s22   ;;  %s2684_s21 = sphi %s2781_s21, %s3315_s21   ;;  %s2680_s20 = sphi %s2779_s20, %s3314_s20   ;;  %s2676_s19 = sphi %s2777_s19, %s3313_s19   ;;  %s2672_s18 = sphi %s2775_s18, %s3319_s18   ;;  %s2668_s17 = sphi %s2773_s17, %s3318_s17  }
   0xc   : > { %3295 = sst [smem:[#allocation22_spill]] %s2676_s19  ;;  %s2064_s26 = sadd.s32 4294967294, %s2696_s24  }
   0xd   : > { %3296 = sst [smem:[#allocation23_spill]] %s2688_s22  ;;  %s37_s27 = sadd.s32 1, %s2688_s22 }
   0xe   : > { %3297 = sst [smem:[#allocation24_spill]] %s2692_s23  ;;  %s40_s28 = sadd.s32 1, %s2692_s23 }
   0xf   : > { %p38_p0 = scmp.ge.s32.totalorder %s37_s27, 2  ;;  %s292_s29 = sadd.s32 1, %s2676_s19 }
  0x10   : > { %p302_p1 = scmp.ne.s32.totalorder %s2676_s19, %s2672_s18  ;;  %p303_p2 = scmp.eq.s32.totalorder %s2063_s25, 3 }
  0x11   : > { %s3321_s27 = smov (%p38_p0, %s37_s27), 0  ;;  %s3323_s28 = smov (!%p38_p0, %s40_s28), %s2692_s23 }
  0x12   : > { %3298 = sst [smem:[#allocation25_spill]] %s3321_s27  ;;  %s288_s30 = ssub.s32 %s2688_s22, %s3321_s27 }
  0x13   : > { %p2825_p3 = por %p303_p2, %p302_p1  ;;  %p42_p4 = scmp.ge.s32.totalorder %s3323_s28, 2 }
  0x14   : > { %p308_p5 = scmp.ne.s32.totalorder %s2672_s18, %s2668_s17  ;;  %p309_p6 = scmp.eq.s32.totalorder %s2064_s26, 3 }
  0x15   : > { %p2065_p7 = scmp.ge.s32.totalorder %s2696_s24, 1  ;;  %s3325_s28 = smov (%p42_p4, %s3323_s28), 0 }
  0x16   : > { %3300 = sst [smem:[#allocation26_spill]] %s3325_s28  ;;  %p2834_p8 = por %p309_p6, %p308_p5 }
  0x17   : > { %p316_p9 = scmp.lt.s32.totalorder %s2696_s24, 5  ;;  %s287_s14 = ssub.s32 %s2692_s23, %s3325_s28 }
  0x18   : > { %s3301_s13 = scalar_select %p2834_p8, 1, 0 }
  0x19   : > { %s289_s15 = sor.u32 %s288_s30, %s287_s14  ;;  %p2841_p10 = pnand %p2065_p7, %p316_p9 }
  0x1a   : > { %3302 = sst [smem:[#allocation27_spill]] %s3301_s13  ;;  %p290_p11 = scmp.eq.s32.totalorder %s289_s15, 0 }
  0x1b   : > { %p2845_p12 = scmp.eq.s32.totalorder %s2063_s25, 0  ;;  %p2304_p13 = pneg %p2841_p10 }
  0x1c   : > { %s2852_s26 = scalar_select %p290_p11, %s2676_s19, %s292_s29  }
  0x1d   : > { %p2856_p0 = pnand %p2845_p12, %p2304_p13  ;;  %s2698_s30 = smov [#allocation7]  }
  0x1e   : > { %3305 = sst [smem:[#allocation28_spill]] %s2852_s26  ;;  %s347_s14 = sshll.u32 %s2698_s30, 4  ;;  %s348_s14 = int_to_ptr.vmem [resolvable:$true] %s347_s14 }
  0x1f   : > { %s2699_s28 = smov [#allocation10]   ;;  %p2862_p1 = pneg %p2856_p0 }
  0x20   : > { %s373_s15 = sshll.u32 %s2699_s28, 4  ;;  %s2443_s23 = scalar_lea.vmem %s348_s14, 512  ;;  %s374_s15 = int_to_ptr.vmem [resolvable:$true] %s373_s15 }
  0x21   : > { %p2444_p2 = scmp.ne.s32.totalorder %s348_s14, %s2443_s23  ;;  %p2451_p6 = scmp.lt.s32.totalorder %s348_s14, %s348_s14 }
  0x22   : > { %p2452_p7 = scmp.lt.s32.totalorder %s2443_s23, %s2443_s23 }
  0x23   : > { %p2446_p4 = pnand %p2444_p2, %p2862_p1 }
  0x24   : > { %p2453_p9 = por %p2452_p7, %p2451_p6 }
  0x25   : > { %p2447_p5 = pneg %p2446_p4 }
  0x27   : > { %p2454_p11 = pnand %p2453_p9, %p2447_p5 }
  0x29   : > { %2457 = shalt.err (!%p2454_p11)
}
  0x2a   : > { %s2700_s29 = smov 128   ;;  %s2701_s28 = smov 8  }
  0x2b   : > { %s3308_s5 = sld [smem:[#allocation29_spill]]  ;;  %s2469_s19 = scalar_lea.vmem %s374_s15, 512 }
  0x2c   : > { %p2470_p13 = scmp.ne.s32.totalorder %s374_s15, %s2469_s19  ;;  %p2477_p5 = scmp.lt.s32.totalorder %s374_s15, %s374_s15 }
  0x2d   : > { %p2478_p6 = scmp.lt.s32.totalorder %s2469_s19, %s2469_s19 }
  0x2e   : > { %p2472_p2 = pnand %p2470_p13, %p2862_p1 }
  0x2f   : > { %p2479_p7 = por %p2478_p6, %p2477_p5 }
  0x30   : > { %p2473_p4 = pneg %p2472_p2 }
  0x31   : > { %2310 = dma.hbm_to_vmem [thread:$0]  (!%p2856_p0), %s3308_s5, 512, %s348_s14, [#allocation8], %s2700_s29, %s2700_s29, %s2701_s28  }
  0x32   : > { %p2480_p9 = pnand %p2479_p7, %p2473_p4 }
  0x34   : > { %2483 = shalt.err (!%p2480_p9)
}
  0x35   : > { %2316 = dma.hbm_to_vmem [thread:$0]  (!%p2856_p0), %s3281_s7, 512, %s374_s15, [#allocation11], %s2700_s29, %s2700_s29, %s2701_s28  }
  0x36   : > { %s2702_s26 = smov [#allocation4]   ;;  %s2703_s30 = smov [#allocation9]  }
  0x37   : > { %s334_s14 = sshll.u32 %s2702_s26, 4  ;;  %s360_s5 = sshll.u32 %s2703_s30, 4  ;;  %s335_s14 = int_to_ptr.vmem [resolvable:$true] %s334_s14  ;;  %s361_s5 = int_to_ptr.vmem [resolvable:$true] %s360_s5 }
  0x38   : > { %s2495_s17 = scalar_lea.vmem %s335_s14, 512  ;;  %p2503_p4 = scmp.lt.s32.totalorder %s335_s14, %s335_s14 }
  0x39   : > { %p2496_p11 = scmp.ne.s32.totalorder %s335_s14, %s2495_s17  ;;  %p2504_p5 = scmp.lt.s32.totalorder %s2495_s17, %s2495_s17 }
  0x3b   : > { %p2498_p13 = pnand %p2496_p11, %p2862_p1  ;;  %p2505_p6 = por %p2504_p5, %p2503_p4 }
  0x3d   : > { %p2499_p2 = pneg %p2498_p13 }
  0x3f   : > { %p2506_p7 = pnand %p2505_p6, %p2499_p2 }
  0x41   : > { %2509 = shalt.err (!%p2506_p7)
}
  0x42   : > { %2307 = dma.hbm_to_vmem [thread:$0]  (!%p2856_p0), %s3278_s4, 512, %s335_s14, [#allocation5], %s2700_s29, %s2700_s29, %s2701_s28  }
  0x43   : > { %s2521_s15 = scalar_lea.vmem %s361_s5, 512  ;;  %p2529_p8 = scmp.lt.s32.totalorder %s361_s5, %s361_s5 }
  0x44   : > { %p2522_p9 = scmp.ne.s32.totalorder %s361_s5, %s2521_s15  ;;  %p2530_p4 = scmp.lt.s32.totalorder %s2521_s15, %s2521_s15 }
  0x46   : > { %p2524_p11 = pnand %p2522_p9, %p2862_p1  ;;  %p2531_p2 = por %p2530_p4, %p2529_p8 }
  0x48   : > { %p2525_p13 = pneg %p2524_p11 }
  0x4a   : > { %p2532_p5 = pnand %p2531_p2, %p2525_p13 }
  0x4c   : > { %2535 = shalt.err (!%p2532_p5)
}
  0x4d   : > { %2313 = dma.hbm_to_vmem [thread:$0]  (!%p2856_p0), %s3280_s6, 512, %s361_s5, [#allocation8], %s2700_s29, %s2700_s29, %s2701_s28  }
  0x4e   : > { %s2704_s26 = smov [#allocation12]   ;;  %s2705_s30 = smov [#allocation13]  }
  0x4f   : > { %s389_s14 = sshll.u32 %s2704_s26, 4  ;;  %s402_s19 = sshll.u32 %s2705_s30, 4  ;;  %s390_s14 = int_to_ptr.vmem [resolvable:$true] %s389_s14  ;;  %s403_s19 = int_to_ptr.vmem [resolvable:$true] %s402_s19 }
  0x50   : > { %s2547_s13 = scalar_lea.vmem %s390_s14, 512  ;;  %p2555_p9 = scmp.lt.s32.totalorder %s390_s14, %s390_s14 }
  0x51   : > { %p2548_p6 = scmp.ne.s32.totalorder %s390_s14, %s2547_s13  ;;  %p2556_p11 = scmp.lt.s32.totalorder %s2547_s13, %s2547_s13 }
  0x53   : > { %p2550_p8 = pnand %p2548_p6, %p2862_p1  ;;  %p2557_p13 = por %p2556_p11, %p2555_p9 }
  0x55   : > { %p2551_p7 = pneg %p2550_p8 }
  0x57   : > { %p2558_p4 = pnand %p2557_p13, %p2551_p7 }
  0x59   : > { %2561 = shalt.err (!%p2558_p4)
}
  0x5a   : > { %2319 = dma.hbm_to_vmem [thread:$0]  (!%p2856_p0), %s3283_s9, 512, %s390_s14, [#allocation11], %s2700_s29, %s2700_s29, %s2701_s28  }
  0x5b   : > { %s2573_s17 = scalar_lea.vmem %s403_s19, 512  ;;  %p2581_p8 = scmp.lt.s32.totalorder %s403_s19, %s403_s19 }
  0x5c   : > { %p2574_p2 = scmp.ne.s32.totalorder %s403_s19, %s2573_s17  ;;  %p2582_p9 = scmp.lt.s32.totalorder %s2573_s17, %s2573_s17 }
  0x5e   : > { %p2576_p5 = pnand %p2574_p2, %p2862_p1  ;;  %p2583_p7 = por %p2582_p9, %p2581_p8 }
  0x60   : > { %p2577_p6 = pneg %p2576_p5 }
  0x62   : > { %p2584_p11 = pnand %p2583_p7, %p2577_p6 }
  0x64   : > { %2587 = shalt.err (!%p2584_p11)
}
  0x65   : > { %2322 = dma.hbm_to_vmem [thread:$0]  (!%p2856_p0), %s3284_s10, 512, %s403_s19, [#allocation14], %s2700_s29, %s2700_s29, %s2701_s28  }
  0x66   : > { %437 = sbr.rel (%p2841_p10) target bundleno = 2914 (0xb62), region = 64 }
  0x6b   : > { %2647 = dma.done.wait (%p2845_p12), [#allocation5], 512  }
  0x6c   : > { %2649 = vsyncadd (%p2845_p12), [#allocation5], 4294966784 }
  0x6d   : > { %2651 = dma.done.wait (%p2845_p12), [#allocation8], 1024  }
  0x6e   : > { %2653 = vsyncadd (%p2845_p12), [#allocation8], 4294966272 }
  0x6f   : > { %2655 = dma.done.wait (%p2845_p12), [#allocation11], 1024  }
  0x70   : > { %2657 = vsyncadd (%p2845_p12), [#allocation11], 4294966272 }
  0x71   : > { %2659 = dma.done.wait (%p2845_p12), [#allocation14], 512  }
  0x72   : > { %2661 = vsyncadd (%p2845_p12), [#allocation14], 4294966784  ;;  %s502_s22 = sand.u32 1, %s2672_s18   ;;  %p505_p10 = scmp.lt.s32.totalorder %s2684_s21, 1 }
  0x73   : > { %s2080_s16 = sshll.u32 %s502_s22, 6  ;;  %p512_p0 = scmp.lt.s32.totalorder %s2680_s20, 1 }
  0x74   : > { %s506_s25 = scalar_select %p505_p10, %s2684_s21, 1 }
  0x75   : > { %s513_s29 = scalar_select %p512_p0, %s2680_s20, 1 }
  0x76   : > { %s2118_s28 = sshll.u32 %s506_s25, 6  ;;  %s2083_s14 = sshll.u32 %s506_s25, 1 }
  0x77   : > { %s2954_s27 = scalar_lea.vmem %s3274_s0, %s2118_s28  ;;  %s515_s13 = sadd.s32 %s2083_s14, %s513_s29 }
  0x78   : > { %s2084_s5 = sshll.u32 %s515_s13, 3  ;;  %s2961_s26 = scalar_lea.vmem [#allocation15], %s2080_s16 }
  0x79   : > { %s2959_s23 = scalar_lea.vmem %s3276_s2, %s2084_s5  ;;  %p2085_p12 = scmp.ne.s32.totalorder %s2680_s20, 0 }
  0x7b   : > { %521 = sbr.rel (%p2085_p12) target bundleno = 529 (0x211), region = 92 }
  0x80   : > { %v529_v0 = vld [vmem:[%s2954_s27 + $0x38] sm:$0xff]  ;;  %v528_v2 = vld [vmem:[%s2954_s27 + $0x30] sm:$0xff]  ;;  %v527_v5 = vld [vmem:[%s2954_s27 + $0x28] sm:$0xff]  ;;  %v2706_v7 = vmov 0.0   ;;  %vm554_vm0 = vcmask 261120  }
  0x81   : > { %v537_v1 = vld [vmem:[%s3275_s1 + $0x38] sm:$0xff]  ;;  %v536_v4 = vld [vmem:[%s3275_s1 + $0x30] sm:$0xff]  ;;  %v535_v6 = vld [vmem:[%s3275_s1 + $0x28] sm:$0xff]  ;;  %679 = vmatprep.mubr.f32.mxu1 %v2706_v7  ;;  %643 = vmatprep.mubr.f32.mxu0 %v2706_v7 }
  0x82   : > { %v545_v3 = vadd.f32 %v537_v1, %v529_v0  ;;  %v544_v8 = vadd.f32 %v536_v4, %v528_v2  ;;  %v543_v9 = vadd.f32 %v535_v6, %v527_v5  ;;  %v526_v10 = vld [vmem:[%s2954_s27 + $0x20] sm:$0xff]  ;;  %v525_v12 = vld [vmem:[%s2954_s27 + $0x18] sm:$0xff]  ;;  %v524_v15 = vld [vmem:[%s2954_s27 + $0x10] sm:$0xff] }
  0x83   : > { %v534_v11 = vld [vmem:[%s3275_s1 + $0x20] sm:$0xff]  ;;  %v533_v14 = vld [vmem:[%s3275_s1 + $0x18] sm:$0xff]  ;;  %v532_v16 = vld [vmem:[%s3275_s1 + $0x10] sm:$0xff] }
  0x84   : > { %2270 = vmatprep.subr.mxu1 %v545_v3  ;;  %v542_v13 = vadd.f32 %v534_v11, %v526_v10  ;;  %603 = vmatprep.subr.mxu0 %v545_v3  ;;  %v541_v17 = vadd.f32 %v533_v14, %v525_v12  ;;  %v540_v18 = vadd.f32 %v532_v16, %v524_v15  ;;  %v523_v19 = vld [vmem:[%s2954_s27 + $0x8] sm:$0xff]  ;;  %v522_v21 = vld [vmem:[%s2954_s27] sm:$0xff]  ;;  %v552_v25 = vld [vmem:[%s3277_s3 + $0x30] sm:$0xff] }
  0x85   : > { %2274 = vmatpush1.msra.mxu1 %v544_v8  ;;  %v531_v20 = vld [vmem:[%s3275_s1 + $0x8] sm:$0xff]  ;;  %604 = vmatpush1.msra.mxu0 %v544_v8  ;;  %v530_v23 = vld [vmem:[%s3275_s1] sm:$0xff]  ;;  %v553_v27 = vld [vmem:[%s3277_s3 + $0x38] sm:$0xff] }
  0x86   : > { %2271 = vmatprep.subr.mxu1 %v543_v9  ;;  %v539_v22 = vadd.f32 %v531_v20, %v523_v19  ;;  %605 = vmatprep.subr.mxu0 %v543_v9  ;;  %v538_v24 = vadd.f32 %v530_v23, %v522_v21  ;;  %v546_v26 = vld [vmem:[%s3277_s3] sm:$0xff]  ;;  %v547_v28 = vld [vmem:[%s3277_s3 + $0x8] sm:$0xff]  ;;  %v548_v30 = vld [vmem:[%s3277_s3 + $0x10] sm:$0xff] }
  0x87   : > { %2275 = vmatpush1.msra.mxu1 %v542_v13  ;;  %606 = vmatpush1.msra.mxu0 %v542_v13  ;;  %v708_v29 = vld [vmem:[#allocation4] sm:$0xff]  ;;  %v709_v31 = vld [vmem:[#allocation4 + $0x8] sm:$0xff]  ;;  %v549_v32 = vld [vmem:[%s3277_s3 + $0x18] sm:$0xff] }
  0x88   : > { %2272 = vmatprep.subr.mxu1 %v541_v17  ;;  %607 = vmatprep.subr.mxu0 %v541_v17  ;;  %v710_v33 = vld [vmem:[#allocation4 + $0x10] sm:$0xff]  ;;  %v550_v34 = vld [vmem:[%s3277_s3 + $0x20] sm:$0xff]  ;;  %v711_v35 = vld [vmem:[#allocation4 + $0x18] sm:$0xff] }
  0x89   : > { %2276 = vmatpush1.msra.mxu1 %v540_v18  ;;  %608 = vmatpush1.msra.mxu0 %v540_v18  ;;  %v551_v36 = vld [vmem:[%s3277_s3 + $0x28] sm:$0xff] }
  0x8a   : > { %2273 = vmatprep.subr.mxu1 %v539_v22  ;;  %609 = vmatprep.subr.mxu0 %v539_v22 }
  0x8b   : > { %2277 = vmatpush1.msra.mxu1 %v538_v24  ;;  %610 = vmatpush1.msra.mxu0 %v538_v24 }
  0x8c   : > { %2092 = vmatmul.mubr.msk.f32.vlgmr.msra.gmra.mxu1 %vm554_vm0, %v552_v25  ;;  %748 = vmatprep.subr.mxu1 %v529_v0 }
  0x8d   : > { %749 = vmatpush1.msra.mxu1 %v528_v2  ;;  %685 = vmatprep.mubr.f32.mxu1 %v2706_v7 }
  0x8e   : > { %750 = vmatprep.subr.mxu1 %v527_v5  ;;  %2086 = vmatmul.mubr.msk.f32.vlgmr.msra.gmra.mxu0 %vm554_vm0, %v546_v26 }
  0x8f   : > { %751 = vmatpush1.msra.mxu1 %v526_v10  ;;  %649 = vmatprep.mubr.f32.mxu0 %v2706_v7 }
  0x90   : > { %2093 = vmatmul.mubr.msk.f32.gmra.mxu1 %vm554_vm0, %v553_v27  ;;  %752 = vmatprep.subr.mxu1 %v525_v12 }
  0x91   : > { %753 = vmatpush1.msra.mxu1 %v524_v15  ;;  %788 = vmatprep.mubr.f32.mxu1 %v2706_v7 }
  0x92   : > { %754 = vmatprep.subr.mxu1 %v523_v19  ;;  %2087 = vmatmul.mubr.msk.f32.gmra.mxu0 %vm554_vm0, %v547_v28 }
  0x93   : > { %755 = vmatpush1.msra.mxu1 %v522_v21  ;;  %655 = vmatprep.mubr.f32.mxu0 %v2706_v7 }
  0x94   : > { %2094 = vmatmul.mubr.msk.f32.vlgmr.msra.gmra.mxu1 %vm554_vm0, %v708_v29 }
  0x95   : > { %794 = vmatprep.mubr.f32.mxu1 %v2706_v7 }
  0x96   : > { %2088 = vmatmul.mubr.msk.f32.gmra.mxu0 %vm554_vm0, %v548_v30 }
  0x97   : > { %661 = vmatprep.mubr.f32.mxu0 %v2706_v7 }
  0x98   : > { %2095 = vmatmul.mubr.msk.f32.gmra.mxu1 %vm554_vm0, %v709_v31 }
  0x99   : > { %800 = vmatprep.mubr.f32.mxu1 %v2706_v7 }
  0x9a   : > { %2089 = vmatmul.mubr.msk.f32.gmra.mxu0 %vm554_vm0, %v549_v32 }
  0x9b   : > { %667 = vmatprep.mubr.f32.mxu0 %v2706_v7 }
  0x9c   : > { %2096 = vmatmul.mubr.msk.f32.gmra.mxu1 %vm554_vm0, %v710_v33 }
  0x9d   : > { %806 = vmatprep.mubr.f32.mxu1 %v2706_v7 }
  0x9e   : > { %2090 = vmatmul.mubr.msk.f32.gmra.mxu0 %vm554_vm0, %v550_v34 }
  0x9f   : > { %673 = vmatprep.mubr.f32.mxu0 %v2706_v7 }
  0xa0   : > { %2097 = vmatmul.mubr.msk.f32.gmra.mxu1 %vm554_vm0, %v711_v35 }
  0xa2   : > { %2091 = vmatmul.mubr.msk.f32.gmra.mxu0 %vm554_vm0, %v551_v36 }
 0x14c   : > { %v681_v37 = vpop.f32.mrf.mxu1 }
 0x14d   : > { %704 = vst [vmem:[#allocation2 + $0x60] sm:$0xff] %v681_v37 }
 0x14e   : > { %v683_v38 = vpop.f32.mrf.mxu1  ;;  %v645_v49 = vpop.f32.mrf.mxu0 }
 0x14f   : > { %705 = vst [vmem:[#allocation2 + $0x70] sm:$0xff] %v683_v38  ;;  %692 = vst [vmem:[#allocation2 + $0x30] sm:$0xff] %v645_v49 }
 0x150   : > { %v687_v39 = vpop.f32.mrf.mxu1  ;;  %v647_v50 = vpop.f32.mrf.mxu0 }
 0x151   : > { %706 = vst [vmem:[#allocation2 + $0x78] sm:$0xff] %v687_v39  ;;  %693 = vst [vmem:[#allocation2] sm:$0xff] %v647_v50 }
 0x152   : > { %v689_v40 = vpop.f32.mrf.mxu1  ;;  %v651_v51 = vpop.f32.mrf.mxu0 }
 0x153   : > { %707 = vst [vmem:[#allocation2 + $0x28] sm:$0xff] %v689_v40  ;;  %694 = vst [vmem:[#allocation2 + $0x58] sm:$0xff] %v651_v51 }
 0x154   : > { %v790_v41 = vpop.f32.mrf.mxu1  ;;  %v653_v52 = vpop.f32.mrf.mxu0 }
 0x155   : > { %813 = vxpose.xlu0.b32.start [1/4] (short) %v790_v41, 128  ;;  %695 = vst [vmem:[#allocation2 + $0x18] sm:$0xff] %v653_v52 }
 0x156   : > { %v792_v42 = vpop.f32.mrf.mxu1  ;;  %v657_v53 = vpop.f32.mrf.mxu0 }
 0x157   : > { %845 = vxpose.xlu1.b32.start [1/4] (short) %v792_v42, 128  ;;  %696 = vst [vmem:[#allocation2 + $0x50] sm:$0xff] %v657_v53 }
 0x158   : > { %v796_v43 = vpop.f32.mrf.mxu1  ;;  %v659_v54 = vpop.f32.mrf.mxu0 }
 0x159   : > { %814 = vxpose.xlu0.b32.cont [2/4] (short) %v796_v43, 128  ;;  %697 = vst [vmem:[#allocation2 + $0x68] sm:$0xff] %v659_v54 }
 0x15a   : > { %v798_v44 = vpop.f32.mrf.mxu1  ;;  %v663_v55 = vpop.f32.mrf.mxu0 }
 0x15b   : > { %846 = vxpose.xlu1.b32.cont [2/4] (short) %v798_v44, 128  ;;  %698 = vst [vmem:[#allocation2 + $0x8] sm:$0xff] %v663_v55 }
 0x15c   : > { %v802_v45 = vpop.f32.mrf.mxu1  ;;  %v665_v56 = vpop.f32.mrf.mxu0 }
 0x15d   : > { %815 = vxpose.xlu0.b32.cont [3/4] (short) %v802_v45, 128  ;;  %699 = vst [vmem:[#allocation2 + $0x48] sm:$0xff] %v665_v56 }
 0x15e   : > { %v804_v46 = vpop.f32.mrf.mxu1  ;;  %v669_v57 = vpop.f32.mrf.mxu0 }
 0x15f   : > { %847 = vxpose.xlu1.b32.cont [3/4] (short) %v804_v46, 128  ;;  %700 = vst [vmem:[#allocation2 + $0x40] sm:$0xff] %v669_v57 }
 0x160   : > { %v808_v47 = vpop.f32.mrf.mxu1  ;;  %v671_v58 = vpop.f32.mrf.mxu0 }
 0x161   : > { %816 = vxpose.xlu0.b32.end [4/4] (short) %v808_v47, 128  ;;  %701 = vst [vmem:[#allocation2 + $0x20] sm:$0xff] %v671_v58 }
 0x162   : > { %v810_v48 = vpop.f32.mrf.mxu1  ;;  %v675_v59 = vpop.f32.mrf.mxu0 }
 0x163   : > { %848 = vxpose.xlu1.b32.end [4/4] (short) %v810_v48, 128  ;;  %702 = vst [vmem:[#allocation2 + $0x10] sm:$0xff] %v675_v59 }
 0x164   : > { %v677_v60 = vpop.f32.mrf.mxu0 }
 0x165   : > { %703 = vst [vmem:[#allocation2 + $0x38] sm:$0xff] %v677_v60 }
 0x1d1   : > { %v829_v61 = vpop.trf.xlu0 }
 0x1d2   : > { %877 = vst.msk [vmem:[#allocation3] sm:$0xff] %vm554_vm0, %v829_v61 }
 0x1d3   : > { %v861_v62 = vpop.trf.xlu1 }
 0x1d4   : > { %893 = vst.msk [vmem:[#allocation3 + $0x80] sm:$0xff] %vm554_vm0, %v861_v62 }
 0x1d5   : > { %v830_v63 = vpop.trf.xlu0 }
 0x1d6   : > { %878 = vst.msk [vmem:[#allocation3 + $0x8] sm:$0xff] %vm554_vm0, %v830_v63 }
 0x1d7   : > { %v862_v0 = vpop.trf.xlu1 }
 0x1d8   : > { %894 = vst.msk [vmem:[#allocation3 + $0x88] sm:$0xff] %vm554_vm0, %v862_v0 }
 0x1d9   : > { %v831_v1 = vpop.trf.xlu0 }
 0x1da   : > { %879 = vst.msk [vmem:[#allocation3 + $0x10] sm:$0xff] %vm554_vm0, %v831_v1 }
 0x1db   : > { %v863_v2 = vpop.trf.xlu1 }
 0x1dc   : > { %895 = vst.msk [vmem:[#allocation3 + $0x90] sm:$0xff] %vm554_vm0, %v863_v2 }
 0x1dd   : > { %v832_v3 = vpop.trf.xlu0 }
 0x1de   : > { %880 = vst.msk [vmem:[#allocation3 + $0x18] sm:$0xff] %vm554_vm0, %v832_v3 }
 0x1df   : > { %v864_v4 = vpop.trf.xlu1 }
 0x1e0   : > { %896 = vst.msk [vmem:[#allocation3 + $0x98] sm:$0xff] %vm554_vm0, %v864_v4 }
 0x1e1   : > { %v833_v5 = vpop.trf.xlu0 }
 0x1e2   : > { %881 = vst.msk [vmem:[#allocation3 + $0x20] sm:$0xff] %vm554_vm0, %v833_v5 }
 0x1e3   : > { %v865_v6 = vpop.trf.xlu1 }
 0x1e4   : > { %897 = vst.msk [vmem:[#allocation3 + $0xa0] sm:$0xff] %vm554_vm0, %v865_v6 }
 0x1e5   : > { %v834_v7 = vpop.trf.xlu0 }
 0x1e6   : > { %882 = vst.msk [vmem:[#allocation3 + $0x28] sm:$0xff] %vm554_vm0, %v834_v7 }
 0x1e7   : > { %v866_v8 = vpop.trf.xlu1 }
 0x1e8   : > { %898 = vst.msk [vmem:[#allocation3 + $0xa8] sm:$0xff] %vm554_vm0, %v866_v8 }
 0x1e9   : > { %v835_v9 = vpop.trf.xlu0 }
 0x1ea   : > { %883 = vst.msk [vmem:[#allocation3 + $0x30] sm:$0xff] %vm554_vm0, %v835_v9 }
 0x1eb   : > { %v867_v10 = vpop.trf.xlu1 }
 0x1ec   : > { %899 = vst.msk [vmem:[#allocation3 + $0xb0] sm:$0xff] %vm554_vm0, %v867_v10 }
 0x1ed   : > { %v836_v11 = vpop.trf.xlu0 }
 0x1ee   : > { %884 = vst.msk [vmem:[#allocation3 + $0x38] sm:$0xff] %vm554_vm0, %v836_v11 }
 0x1ef   : > { %v868_v12 = vpop.trf.xlu1 }
 0x1f0   : > { %900 = vst.msk [vmem:[#allocation3 + $0xb8] sm:$0xff] %vm554_vm0, %v868_v12 }
 0x1f1   : > { %v837_v13 = vpop.trf.xlu0 }
 0x1f2   : > { %885 = vst.msk [vmem:[#allocation3 + $0x40] sm:$0xff] %vm554_vm0, %v837_v13 }
 0x1f3   : > { %v869_v14 = vpop.trf.xlu1 }
 0x1f4   : > { %901 = vst.msk [vmem:[#allocation3 + $0xc0] sm:$0xff] %vm554_vm0, %v869_v14 }
 0x1f5   : > { %v838_v15 = vpop.trf.xlu0 }
 0x1f6   : > { %886 = vst.msk [vmem:[#allocation3 + $0x48] sm:$0xff] %vm554_vm0, %v838_v15 }
 0x1f7   : > { %v870_v16 = vpop.trf.xlu1 }
 0x1f8   : > { %902 = vst.msk [vmem:[#allocation3 + $0xc8] sm:$0xff] %vm554_vm0, %v870_v16 }
 0x1f9   : > { %v839_v17 = vpop.trf.xlu0 }
 0x1fa   : > { %887 = vst.msk [vmem:[#allocation3 + $0x50] sm:$0xff] %vm554_vm0, %v839_v17 }
 0x1fb   : > { %v871_v18 = vpop.trf.xlu1 }
 0x1fc   : > { %903 = vst.msk [vmem:[#allocation3 + $0xd0] sm:$0xff] %vm554_vm0, %v871_v18 }
 0x1fd   : > { %v840_v19 = vpop.trf.xlu0 }
 0x1fe   : > { %888 = vst.msk [vmem:[#allocation3 + $0x58] sm:$0xff] %vm554_vm0, %v840_v19 }
 0x1ff   : > { %v872_v20 = vpop.trf.xlu1 }
 0x200   : > { %904 = vst.msk [vmem:[#allocation3 + $0xd8] sm:$0xff] %vm554_vm0, %v872_v20 }
 0x201   : > { %v841_v21 = vpop.trf.xlu0 }
 0x202   : > { %889 = vst.msk [vmem:[#allocation3 + $0x60] sm:$0xff] %vm554_vm0, %v841_v21 }
 0x203   : > { %v873_v22 = vpop.trf.xlu1 }
 0x204   : > { %905 = vst.msk [vmem:[#allocation3 + $0xe0] sm:$0xff] %vm554_vm0, %v873_v22 }
 0x205   : > { %v842_v23 = vpop.trf.xlu0 }
 0x206   : > { %890 = vst.msk [vmem:[#allocation3 + $0x68] sm:$0xff] %vm554_vm0, %v842_v23 }
 0x207   : > { %v874_v24 = vpop.trf.xlu1 }
 0x208   : > { %906 = vst.msk [vmem:[#allocation3 + $0xe8] sm:$0xff] %vm554_vm0, %v874_v24 }
 0x209   : > { %v843_v25 = vpop.trf.xlu0 }
 0x20a   : > { %891 = vst.msk [vmem:[#allocation3 + $0x70] sm:$0xff] %vm554_vm0, %v843_v25 }
 0x20b   : > { %v875_v26 = vpop.trf.xlu1 }
 0x20c   : > { %907 = vst.msk [vmem:[#allocation3 + $0xf0] sm:$0xff] %vm554_vm0, %v875_v26 }
 0x20d   : > { %v844_v27 = vpop.trf.xlu0 }
 0x20e   : > { %892 = vst.msk [vmem:[#allocation3 + $0x78] sm:$0xff] %vm554_vm0, %v844_v27 }
 0x20f   : > { %v876_v28 = vpop.trf.xlu1 }
 0x210   : > { %908 = vst.msk [vmem:[#allocation3 + $0xf8] sm:$0xff] %vm554_vm0, %v876_v28 }
 0x211 PF: > { %v929_v29 = vld [vmem:[#allocation7 + $0x18] sm:$0xff]  ;;  %v2707_v30 = vmov 0.0   ;;  %v928_v31 = vld [vmem:[#allocation7 + $0x10] sm:$0xff]  ;;  %vm2708_vm1 = vmmov 0   ;;  %v916_v32 = vld [vmem:[#allocation2 + $0x48] sm:$0xff]  ;;  %vm930_vm2 = vcmask 261120  }
 0x212   : > { %2191 = vmatprep.subr.mxu0 %v2707_v30  ;;  %2199 = vmatprep.mubr.msk.f32.mxu0 %vm2708_vm1, %v2707_v30  ;;  %v915_v33 = vld [vmem:[#allocation2 + $0x8] sm:$0xff]  ;;  %v913_v35 = vld [vmem:[#allocation2 + $0x50] sm:$0xff]  ;;  %v912_v37 = vld [vmem:[#allocation2 + $0x18] sm:$0xff]  ;;  %s2709_s19 = smov 96   ;;  %vm1662_vm3 = vcmask 64512   ;;  %s2113_s13 = sshll.u32 %s2680_s20, 3 }
 0x213   : > { %2192 = vmatpush3.msra.mxu0 %v929_v29  ;;  %1031 = vmatprep.subr.mxu1 %v916_v32  ;;  %v914_v34 = vld [vmem:[#allocation2 + $0x68] sm:$0xff]  ;;  %v911_v38 = vld [vmem:[#allocation2 + $0x58] sm:$0xff]  ;;  %v926_v39 = vld [vmem:[#allocation7] sm:$0xff]  ;;  %s2114_s5 = sshll.u32 %s2684_s21, 4  ;;  %s1909_s21 = sshll.u32 %s2961_s26, 4  ;;  %s3217_s21 = int_to_ptr.vmem [resolvable:$true] %s1909_s21 }
 0x214   : > { %2193 = vmatprep.subr.mxu0 %v2707_v30  ;;  %v927_v36 = vld [vmem:[#allocation7 + $0x8] sm:$0xff]  ;;  %1032 = vmatpush1.msra.mxu1 %v915_v33  ;;  %v910_v40 = vld [vmem:[#allocation2] sm:$0xff]  ;;  %v909_v42 = vld [vmem:[#allocation2 + $0x30] sm:$0xff]  ;;  %s1906_s15 = sadd.s32 %s2114_s5, %s2113_s13  ;;  %s3223_s28 = scalar_lea.sflag [#allocation6], %s502_s22 }
 0x215   : > { %2194 = vmatpush3.msra.mxu0 %v928_v31  ;;  %1033 = vmatprep.subr.mxu1 %v914_v34  ;;  %v3082_v41 = vld [vmem:[%s2959_s23] sm:$0xff]  ;;  %v1110_v51 = vld [vmem:[#allocation3 + $0x78] sm:$0xff]  ;;  %v1125_v52 = vld [vmem:[#allocation3 + $0xf0] sm:$0xff]  ;;  %s2115_s20 = sshll.u32 %s1906_s15, 7  ;;  %s2710_s29 = smov [#allocation15]  }
 0x216   : > { %2195 = vmatprep.subr.mxu0 %v2707_v30  ;;  %1034 = vmatpush1.msra.mxu1 %v913_v35  ;;  %v1109_v53 = vld [vmem:[#allocation3 + $0x70] sm:$0xff]  ;;  %v1124_v54 = vld [vmem:[#allocation3 + $0xe8] sm:$0xff]  ;;  %v1123_v56 = vld [vmem:[#allocation3 + $0xe0] sm:$0xff]  ;;  %s3215_s25 = scalar_lea.hbm %s3285_s11, %s2115_s20  ;;  %s2592_s14 = sshll.u32 %s2710_s29, 4  ;;  %s2593_s14 = int_to_ptr.vmem [resolvable:$false] %s2592_s14 }
 0x217   : > { %2196 = vmatpush3.msra.mxu0 %v927_v36  ;;  %1035 = vmatprep.subr.mxu1 %v912_v37  ;;  %v1126_v50 = vld [vmem:[#allocation3 + $0xf8] sm:$0xff]  ;;  %v1108_v55 = vld [vmem:[#allocation3 + $0x68] sm:$0xff]  ;;  %v1107_v57 = vld [vmem:[#allocation3 + $0x60] sm:$0xff]  ;;  %s2594_s16 = scalar_lea.vmem %s2593_s14, 2048  ;;  %p2595_p2 = scmp.lt.s32.totalorder %s3217_s21, %s2593_s14 }
 0x218   : > { %2197 = vmatprep.subr.mxu0 %v2707_v30  ;;  %1036 = vmatpush1.msra.mxu1 %v911_v38  ;;  %v1122_v58 = vld [vmem:[#allocation3 + $0xd8] sm:$0xff]  ;;  %v1121_v60 = vld [vmem:[#allocation3 + $0xd0] sm:$0xff]  ;;  %v1120_v62 = vld [vmem:[#allocation3 + $0xc8] sm:$0xff] }
 0x219   : > { %2198 = vmatpush3.msra.mxu0 %v926_v39  ;;  %1037 = vmatprep.subr.mxu1 %v910_v40  ;;  %v1106_v59 = vld [vmem:[#allocation3 + $0x58] sm:$0xff]  ;;  %v1105_v61 = vld [vmem:[#allocation3 + $0x50] sm:$0xff]  ;;  %v1104_v63 = vld [vmem:[#allocation3 + $0x48] sm:$0xff] }
 0x21a   : > { %2200 = vmatmul.mubr.msk.f32.vlgmr.msra.gmra.mxu0 %vm930_vm2, %v3082_v41  ;;  %1071 = vmatprep.mubr.f32.mxu1 %v2707_v30  ;;  %v1119_v0 = vld [vmem:[#allocation3 + $0xc0] sm:$0xff]  ;;  %v1118_v10 = vld [vmem:[#allocation3 + $0xb8] sm:$0xff]  ;;  %v1117_v12 = vld [vmem:[#allocation3 + $0xb0] sm:$0xff] }
 0x21b   : > { %1038 = vmatpush1.msra.mxu1 %v909_v42  ;;  %2124 = vmatprep.subr.mxu0 %v1126_v50  ;;  %v1103_v9 = vld [vmem:[#allocation3 + $0x40] sm:$0xff]  ;;  %v1102_v11 = vld [vmem:[#allocation3 + $0x38] sm:$0xff]  ;;  %v1101_v13 = vld [vmem:[#allocation3 + $0x30] sm:$0xff] }
 0x21c   : > { %2202 = vmatprep.subr.mxu1 %v2707_v30  ;;  %2125 = vmatpush3.msra.mxu0 %v1110_v51  ;;  %v1116_v14 = vld [vmem:[#allocation3 + $0xa8] sm:$0xff]  ;;  %v1115_v16 = vld [vmem:[#allocation3 + $0xa0] sm:$0xff]  ;;  %v1114_v18 = vld [vmem:[#allocation3 + $0x98] sm:$0xff] }
 0x21d   : > { %2126 = vmatprep.subr.mxu0 %v1125_v52  ;;  %v1100_v15 = vld [vmem:[#allocation3 + $0x28] sm:$0xff]  ;;  %v1099_v17 = vld [vmem:[#allocation3 + $0x20] sm:$0xff]  ;;  %v1098_v19 = vld [vmem:[#allocation3 + $0x18] sm:$0xff] }
 0x21e   : > { %2127 = vmatpush3.msra.mxu0 %v1109_v53  ;;  %v1113_v20 = vld [vmem:[#allocation3 + $0x90] sm:$0xff]  ;;  %v1112_v22 = vld [vmem:[#allocation3 + $0x88] sm:$0xff]  ;;  %v1111_v24 = vld [vmem:[#allocation3 + $0x80] sm:$0xff] }
 0x21f   : > { %2128 = vmatprep.subr.mxu0 %v1124_v54  ;;  %v1097_v21 = vld [vmem:[#allocation3 + $0x10] sm:$0xff]  ;;  %v1096_v23 = vld [vmem:[#allocation3 + $0x8] sm:$0xff]  ;;  %v1095_v25 = vld [vmem:[#allocation3] sm:$0xff] }
 0x220   : > { %2129 = vmatpush3.msra.mxu0 %v1108_v55  ;;  %v1200_v26 = vld [vmem:[#allocation9 + $0x18] sm:$0xff]  ;;  %v1199_v32 = vld [vmem:[#allocation9 + $0x10] sm:$0xff]  ;;  %v1198_v33 = vld [vmem:[#allocation9 + $0x8] sm:$0xff] }
 0x221   : > { %2130 = vmatprep.subr.mxu0 %v1123_v56  ;;  %v1197_v34 = vld [vmem:[#allocation9] sm:$0xff]  ;;  %v1278_v38 = vld [vmem:[#allocation10 + $0x18] sm:$0xff]  ;;  %v1277_v39 = vld [vmem:[#allocation10 + $0x10] sm:$0xff] }
 0x222   : > { %2131 = vmatpush3.msra.mxu0 %v1107_v57  ;;  %v1276_v40 = vld [vmem:[#allocation10 + $0x8] sm:$0xff]  ;;  %v1275_v42 = vld [vmem:[#allocation10] sm:$0xff]  ;;  %v1363_v50 = vld [vmem:[%s3282_s8 + $0x50] sm:$0xff] }
 0x223   : > { %2132 = vmatprep.subr.mxu0 %v1122_v58  ;;  %v1362_v51 = vld [vmem:[%s3282_s8 + $0x48] sm:$0xff]  ;;  %v1361_v52 = vld [vmem:[%s3282_s8 + $0x40] sm:$0xff]  ;;  %v1360_v53 = vld [vmem:[%s3282_s8 + $0x38] sm:$0xff] }
 0x224   : > { %2133 = vmatpush3.msra.mxu0 %v1106_v59  ;;  %v1359_v54 = vld [vmem:[%s3282_s8 + $0x30] sm:$0xff]  ;;  %v1358_v55 = vld [vmem:[%s3282_s8 + $0x28] sm:$0xff]  ;;  %v1357_v56 = vld [vmem:[%s3282_s8 + $0x20] sm:$0xff] }
 0x225   : > { %2134 = vmatprep.subr.mxu0 %v1121_v60  ;;  %v1356_v57 = vld [vmem:[%s3282_s8 + $0x18] sm:$0xff]  ;;  %v1355_v58 = vld [vmem:[%s3282_s8 + $0x10] sm:$0xff]  ;;  %v1354_v59 = vld [vmem:[%s3282_s8 + $0x8] sm:$0xff] }
 0x226   : > { %2135 = vmatpush3.msra.mxu0 %v1105_v61  ;;  %v1353_v60 = vld [vmem:[%s3282_s8] sm:$0xff]  ;;  %v1443_v61 = vld [vmem:[#allocation12 + $0x18] sm:$0xff] }
 0x227   : > { %2136 = vmatprep.subr.mxu0 %v1120_v62  ;;  %v1442_v62 = vld [vmem:[#allocation12 + $0x10] sm:$0xff] }
 0x228   : > { %2137 = vmatpush3.msra.mxu0 %v1104_v63 }
 0x229   : > { %2138 = vmatprep.subr.mxu0 %v1119_v0 }
 0x22a   : > { %2139 = vmatpush3.msra.mxu0 %v1103_v9  ;;  %v922_v9 = vld [vmem:[#allocation2 + $0x70] sm:$0xff] }
 0x22b   : > { %2140 = vmatprep.subr.mxu0 %v1118_v10  ;;  %v921_v10 = vld [vmem:[#allocation2 + $0x60] sm:$0xff] }
 0x22c   : > { %2141 = vmatpush3.msra.mxu0 %v1102_v11  ;;  %v920_v11 = vld [vmem:[#allocation2 + $0x38] sm:$0xff] }
 0x22d   : > { %2142 = vmatprep.subr.mxu0 %v1117_v12  ;;  %v919_v12 = vld [vmem:[#allocation2 + $0x10] sm:$0xff] }
 0x22e   : > { %2143 = vmatpush3.msra.mxu0 %v1101_v13  ;;  %v918_v13 = vld [vmem:[#allocation2 + $0x20] sm:$0xff] }
 0x22f   : > { %2144 = vmatprep.subr.mxu0 %v1116_v14  ;;  %v917_v14 = vld [vmem:[#allocation2 + $0x40] sm:$0xff] }
 0x230   : > { %2145 = vmatpush3.msra.mxu0 %v1100_v15 }
 0x231   : > { %2146 = vmatprep.subr.mxu0 %v1115_v16 }
 0x232   : > { %2147 = vmatpush3.msra.mxu0 %v1099_v17 }
 0x233   : > { %2148 = vmatprep.subr.mxu0 %v1114_v18 }
 0x234   : > { %2149 = vmatpush3.msra.mxu0 %v1098_v19 }
 0x235   : > { %2150 = vmatprep.subr.mxu0 %v1113_v20 }
 0x236   : > { %2151 = vmatpush3.msra.mxu0 %v1097_v21 }
 0x237   : > { %2152 = vmatprep.subr.mxu0 %v1112_v22 }
 0x238   : > { %2153 = vmatpush3.msra.mxu0 %v1096_v23 }
 0x239   : > { %2154 = vmatprep.subr.mxu0 %v1111_v24 }
 0x23a   : > { %2155 = vmatpush3.msra.mxu0 %v1095_v25 }
 0x23b   : > { %2259 = vmatprep.subr.mxu0 %v2707_v30 }
 0x2da   : > { %v1000_v43 = vpop.f32.mrf.mxu0 }
 0x2db   : > { %2099 = vmatmul.mubr.msk.f32.vlgmr.msra.gmra.mxu1 %vm930_vm2, %v1000_v43 }
 0x2dc   : > { %v2201_v44 = vpop.f32.mrf.mxu0  ;;  %2210 = vmatprep.mubr.msk.f32.mxu1 %vm2708_vm1, %v2707_v30  ;;  %2203 = vmatpush3.msra.mxu1 %v1200_v26 }
 0x2dd   : > { %2204 = vmatprep.subr.mxu1 %v2707_v30 }
 0x2de   : > { %2205 = vmatpush3.msra.mxu1 %v1199_v32 }
 0x2df   : > { %2206 = vmatprep.subr.mxu1 %v2707_v30 }
 0x2e0   : > { %2207 = vmatpush3.msra.mxu1 %v1198_v33 }
 0x2e1   : > { %2208 = vmatprep.subr.mxu1 %v2707_v30 }
 0x2e2   : > { %2209 = vmatpush3.msra.mxu1 %v1197_v34 }
 0x2e3   : > { %2213 = vmatprep.subr.mxu1 %v2707_v30 }
 0x39b   : > { %v1073_v45 = vpop.f32.mrf.mxu1 }
 0x39c   : > { %v1078_v47 = vmul.f32 0.17677669, %v1073_v45  ;;  %v1368_v45 = vld [vmem:[%s3282_s8 + $0x78] sm:$0xff] }
 0x39d   : > { %v1075_v46 = vpop.f32.mrf.mxu1 }
 0x39e   : > { %v1079_v48 = vmul.f32 0.17677669, %v1075_v46 }
 0x3a0   : > { %v1080_v49 = vmax.f32 %v1078_v47, %v1079_v48 }
 0x3a2   : > { %1081 = vmax.xlane.f32.xlu0 %v1080_v49  ;;  %v1364_v49 = vld [vmem:[%s3282_s8 + $0x58] sm:$0xff] }
 0x42b   : > { %v1082_v1 = vpop.xlane.xlu0 %1081 }
 0x42c   : > { %v1083_v2 = vsub.f32 %v1078_v47, %v1082_v1  ;;  %v1084_v3 = vsub.f32 %v1079_v48, %v1082_v1  ;;  %v1367_v47 = vld [vmem:[%s3282_s8 + $0x70] sm:$0xff]  ;;  %v1365_v48 = vld [vmem:[%s3282_s8 + $0x60] sm:$0xff] }
 0x42e   : > { %v1085_v4 = vmul.f32 1.442695, %v1083_v2  ;;  %v1087_v5 = vmul.f32 1.442695, %v1084_v3  ;;  %v1441_v2 = vld [vmem:[#allocation12 + $0x8] sm:$0xff]  ;;  %v1440_v3 = vld [vmem:[#allocation12] sm:$0xff] }
 0x430   : > { %2418 = vpow2.f32 %v1085_v4  ;;  %v924_v4 = vld [vmem:[#allocation2 + $0x28] sm:$0xff] }
 0x431   : > { %2420 = vpow2.f32 %v1087_v5 }
 0x43d   : > { %v2419_v6 = vpop.eup %2418 }
 0x43e   : > { %v2421_v7 = vpop.eup %2420 }
 0x43f   : > { %v1089_v8 = vadd.f32 %v2421_v7, %v2419_v6 }
 0x441   : > { %1090 = vadd.xlane.f32.xlu0 %v1089_v8 }
 0x4ca   : > { %v1091_v27 = vpop.xlane.xlu0 %1090 }
 0x4cb   : > { %2422 = vrcp.f32 %v1091_v27 }
 0x4d8   : > { %v2423_v28 = vpop.eup %2422 }
 0x4d9   : > { %v1094_v29 = vmul.f32 %v2423_v28, %v2421_v7  ;;  %v1093_v31 = vmul.f32 %v2423_v28, %v2419_v6  ;;  %v923_v7 = vld [vmem:[#allocation2 + $0x78] sm:$0xff] }
 0x4db   : > { %1191 = vmatprep.mubr.f32.mxu0 %v1094_v29 }
 0x4dc   : > { %1192 = vmatmul.mubr.f32.vlgmr.msra.gmra.mxu0 %v1093_v31 }
 0x4dd   : > { %2267 = vmatprep.mubr.msk.f32.mxu0 %vm2708_vm1, %v2707_v30  ;;  %2260 = vmatpush3.msra.mxu0 %v1443_v61 }
 0x4de   : > { %2261 = vmatprep.subr.mxu0 %v2707_v30 }
 0x4df   : > { %2262 = vmatpush3.msra.mxu0 %v1442_v62 }
 0x4e0   : > { %2263 = vmatprep.subr.mxu0 %v2707_v30 }
 0x4e1   : > { %2264 = vmatpush3.msra.mxu0 %v1441_v2 }
 0x4e2   : > { %2265 = vmatprep.subr.mxu0 %v2707_v30 }
 0x4e3   : > { %2266 = vmatpush3.msra.mxu0 %v1440_v3 }
 0x4e4   : > { %1544 = vmatprep.subr.mxu0 %v924_v4 }
 0x59c   : > { %v2156_v35 = vpop.f32.mrf.mxu0 }
 0x59e   : > { %v2157_v36 = vpop.f32.mrf.mxu0 }
 0x59f   : > { %v2158_v37 = vadd.f32 %v2157_v36, %v2156_v35 }
 0x5a1   : > { %2211 = vmatmul.mubr.msk.f32.vlgmr.msra.gmra.mxu1 %vm930_vm2, %v2158_v37 }
 0x5a2   : > { %2214 = vmatpush3.msra.mxu1 %v1278_v38  ;;  %2221 = vmatprep.mubr.msk.f32.mxu1 %vm2708_vm1, %v2707_v30 }
 0x5a3   : > { %2215 = vmatprep.subr.mxu1 %v2707_v30 }
 0x5a4   : > { %2216 = vmatpush3.msra.mxu1 %v1277_v39 }
 0x5a5   : > { %2217 = vmatprep.subr.mxu1 %v2707_v30 }
 0x5a6   : > { %2218 = vmatpush3.msra.mxu1 %v1276_v40 }
 0x5a7   : > { %2219 = vmatprep.subr.mxu1 %v2707_v30 }
 0x5a8   : > { %2220 = vmatpush3.msra.mxu1 %v1275_v42 }
 0x5a9   : > { %2224 = vmatprep.subr.mxu1 %v2707_v30 }
 0x661   : > { %v1270_v43 = vpop.f32.mrf.mxu1 }
 0x662   : > { %v3107_v44 = vadd.f32 %v1270_v43, %v3082_v41  ;;  %v1366_v41 = vld [vmem:[%s3282_s8 + $0x68] sm:$0xff] }
 0x663   : > { %v2212_v46 = vpop.f32.mrf.mxu1 }
 0x664   : > { %2222 = vmatmul.mubr.msk.f32.vlgmr.msra.gmra.mxu1 %vm930_vm2, %v3107_v44 }
 0x665   : > { %2225 = vmatpush3.msra.mxu1 %v1368_v45  ;;  %2256 = vmatprep.mubr.msk.f32.mxu1 %vm2708_vm1, %v2707_v30 }
 0x666   : > { %2226 = vmatprep.subr.mxu1 %v2707_v30 }
 0x667   : > { %2227 = vmatpush3.msra.mxu1 %v1367_v47 }
 0x668   : > { %2228 = vmatprep.subr.mxu1 %v2707_v30 }
 0x669   : > { %2229 = vmatpush3.msra.mxu1 %v1366_v41 }
 0x66a   : > { %2230 = vmatprep.subr.mxu1 %v2707_v30 }
 0x66b   : > { %2231 = vmatpush3.msra.mxu1 %v1365_v48 }
 0x66c   : > { %2232 = vmatprep.subr.mxu1 %v2707_v30 }
 0x66d   : > { %2233 = vmatpush3.msra.mxu1 %v1364_v49 }
 0x66e   : > { %2234 = vmatprep.subr.mxu1 %v2707_v30 }
 0x66f   : > { %2235 = vmatpush3.msra.mxu1 %v1363_v50 }
 0x670   : > { %2236 = vmatprep.subr.mxu1 %v2707_v30 }
 0x671   : > { %2237 = vmatpush3.msra.mxu1 %v1362_v51 }
 0x672   : > { %2238 = vmatprep.subr.mxu1 %v2707_v30 }
 0x673   : > { %2239 = vmatpush3.msra.mxu1 %v1361_v52 }
 0x674   : > { %2240 = vmatprep.subr.mxu1 %v2707_v30 }
 0x675   : > { %2241 = vmatpush3.msra.mxu1 %v1360_v53 }
 0x676   : > { %2242 = vmatprep.subr.mxu1 %v2707_v30 }
 0x677   : > { %2243 = vmatpush3.msra.mxu1 %v1359_v54 }
 0x678   : > { %2244 = vmatprep.subr.mxu1 %v2707_v30 }
 0x679   : > { %2245 = vmatpush3.msra.mxu1 %v1358_v55 }
 0x67a   : > { %2246 = vmatprep.subr.mxu1 %v2707_v30 }
 0x67b   : > { %2247 = vmatpush3.msra.mxu1 %v1357_v56 }
 0x67c   : > { %2248 = vmatprep.subr.mxu1 %v2707_v30 }
 0x67d   : > { %2249 = vmatpush3.msra.mxu1 %v1356_v57 }
 0x67e   : > { %2250 = vmatprep.subr.mxu1 %v2707_v30 }
 0x67f   : > { %2251 = vmatpush3.msra.mxu1 %v1355_v58 }
 0x680   : > { %2252 = vmatprep.subr.mxu1 %v2707_v30 }
 0x681   : > { %2253 = vmatpush3.msra.mxu1 %v1354_v59 }
 0x682   : > { %2254 = vmatprep.subr.mxu1 %v2707_v30 }
 0x683   : > { %2255 = vmatpush3.msra.mxu1 %v1353_v60 }
 0x724   : > { %v1348_v63 = vpop.f32.mrf.mxu1 }
 0x725   : > { %v1352_v0 = vmax.f32 %v1348_v63, 0.0 }
 0x726   : > { %v2223_v1 = vpop.f32.mrf.mxu1 }
 0x727   : > { %2257 = vmatmul.mubr.f32.vlgmr.msra.gmra.mxu1 %v1352_v0 }
 0x728   : > { %1844 = vmatprep.mubr.f32.mxu1 %v2707_v30 }
 0x7e7   : > { %v1435_v5 = vpop.f32.mrf.mxu1 }
 0x7e8   : > { %v1439_v6 = vadd.f32 %v1435_v5, %v3107_v44  ;;  %v1764_v5 = vld [vmem:[#allocation13] sm:$0xff] }
 0x7e9   : > { %v2258_v8 = vpop.f32.mrf.mxu1 }
 0x7ea   : > { %2268 = vmatmul.mubr.msk.f32.vlgmr.msra.gmra.mxu0 %vm930_vm2, %v1439_v6  ;;  %v1765_v6 = vld [vmem:[#allocation13 + $0x8] sm:$0xff]  ;;  %v1767_v8 = vld [vmem:[#allocation13 + $0x18] sm:$0xff] }
 0x7eb   : > { %1545 = vmatpush1.msra.mxu0 %v923_v7  ;;  %1584 = vmatprep.mubr.f32.mxu0 %v2707_v30  ;;  %v1766_v7 = vld [vmem:[#allocation13 + $0x10] sm:$0xff] }
 0x7ec   : > { %1546 = vmatprep.subr.mxu0 %v922_v9  ;;  %v1869_v9 = vld [vmem:[%s2954_s27] sm:$0xff] }
 0x7ed   : > { %1547 = vmatpush1.msra.mxu0 %v921_v10 }
 0x7ee   : > { %1548 = vmatprep.subr.mxu0 %v920_v11  ;;  %v1870_v11 = vld [vmem:[%s2954_s27 + $0x8] sm:$0xff] }
 0x7ef   : > { %1549 = vmatpush1.msra.mxu0 %v919_v12 }
 0x7f0   : > { %1550 = vmatprep.subr.mxu0 %v918_v13 }
 0x7f1   : > { %1551 = vmatpush1.msra.mxu0 %v917_v14  ;;  %v1871_v14 = vld [vmem:[%s2954_s27 + $0x10] sm:$0xff] }
 0x8aa   : > { %v1513_v15 = vpop.f32.mrf.mxu0 }
 0x8ab   : > { %1627 = vrot.lane.b32.xlu1 %v1513_v15, %s2709_s19  ;;  %2103 = vmatmul.mubr.msk.f32.vlgmr.msra.gmra.mxu0 %vm930_vm2, %v1513_v15 }
 0x8ac   : > { %v2269_v16 = vpop.f32.mrf.mxu0  ;;  %1739 = vmatprep.mubr.f32.mxu0 %v2707_v30 }
 0x91d   : > { %v1628_v17 = vpop.permute.xlu1 %1627 }
 0x91e   : > { %1630 = vxpose.xlu1.b32.start.end [1/1] (short) (narrow) %v1628_v17, 32  ;;  %v1872_v17 = vld [vmem:[%s2954_s27 + $0x18] sm:$0xff] }
 0x96b   : > { %v1586_v18 = vpop.f32.mrf.mxu0 }
 0x96c   : > { %v1591_v19 = vmul.f32 0.17677669, %v1586_v18 }
 0x96d   : > { %v1588_v20 = vpop.f32.mrf.mxu0 }
 0x96e   : > { %v1593_v21 = vrot.slane %v1591_v19, 4  ;;  %v1592_v22 = vmul.f32 0.17677669, %v1588_v20 }
 0x970   : > { %v1594_v23 = vmax.f32 %v1591_v19, %v1593_v21  ;;  %v1599_v24 = vrot.slane %v1592_v22, 4 }
 0x972   : > { %v1595_v25 = vrot.slane %v1594_v23, 2  ;;  %v1600_v26 = vmax.f32 %v1592_v22, %v1599_v24 }
 0x974   : > { %v1596_v27 = vmax.f32 %v1594_v23, %v1595_v25  ;;  %v1601_v28 = vrot.slane %v1600_v26, 2  ;;  %v1875_v25 = vld [vmem:[%s2954_s27 + $0x30] sm:$0xff] }
 0x976   : > { %v1597_v29 = vrot.slane %v1596_v27, 1  ;;  %v1602_v31 = vmax.f32 %v1600_v26, %v1601_v28  ;;  %v1876_v28 = vld [vmem:[%s2954_s27 + $0x38] sm:$0xff] }
 0x978   : > { %v1598_v32 = vmax.f32 %v1596_v27, %v1597_v29  ;;  %v1603_v33 = vrot.slane %v1602_v31, 1 }
 0x97a   : > { %v1605_v34 = vsub.f32 %v1591_v19, %v1598_v32  ;;  %v1604_v35 = vmax.f32 %v1602_v31, %v1603_v33  ;;  %v1873_v19 = vld [vmem:[%s2954_s27 + $0x20] sm:$0xff] }
 0x97c   : > { %v1607_v36 = vmul.f32 1.442695, %v1605_v34  ;;  %v1606_v37 = vsub.f32 %v1592_v22, %v1604_v35  ;;  %v1874_v22 = vld [vmem:[%s2954_s27 + $0x28] sm:$0xff]  ;;  %s2588_s27 = scalar_lea.vmem %s3217_s21, 1024 }
 0x97d   : > { %p2589_p1 = scmp.ne.s32.totalorder %s3217_s21, %s2588_s27  ;;  %p2596_p5 = scmp.lt.s32.totalorder %s2594_s16, %s2588_s27 }
 0x97e   : > { %2424 = vpow2.f32 %v1607_v36  ;;  %v1609_v38 = vmul.f32 1.442695, %v1606_v37 }
 0x97f   : > { %p2590_p13 = pnand %p2589_p1, %p2825_p3  ;;  %p2597_p6 = por %p2596_p5, %p2595_p2 }
 0x980   : > { %2426 = vpow2.f32 %v1609_v38 }
 0x981   : > { %p2591_p4 = pneg %p2590_p13 }
 0x983   : > { %p2598_p8 = pnand %p2597_p6, %p2591_p4 }
 0x98b   : > { %v2425_v39 = vpop.eup %2424 }
 0x98c   : > { %v1611_v40 = vrot.slane %v2425_v39, 4 }
 0x98d   : > { %v2427_v42 = vpop.eup %2426 }
 0x98e   : > { %v1617_v43 = vrot.slane %v2427_v42, 4  ;;  %v1612_v44 = vadd.f32 %v2425_v39, %v1611_v40 }
 0x990   : > { %v1618_v45 = vadd.f32 %v2427_v42, %v1617_v43  ;;  %v1613_v46 = vrot.slane %v1612_v44, 2 }
 0x992   : > { %v1619_v47 = vrot.slane %v1618_v45, 2  ;;  %v1614_v41 = vadd.f32 %v1613_v46, %v1612_v44 }
 0x994   : > { %v1620_v48 = vadd.f32 %v1619_v47, %v1618_v45  ;;  %v1615_v49 = vrot.slane %v1614_v41, 1 }
 0x996   : > { %v1621_v50 = vrot.slane %v1620_v48, 1  ;;  %v1616_v51 = vadd.f32 %v1615_v49, %v1614_v41 }
 0x998   : > { %v1622_v52 = vadd.f32 %v1621_v50, %v1620_v48  ;;  %2428 = vrcp.f32 %v1616_v51 }
 0x99a   : > { %2430 = vrcp.f32 %v1622_v52  ;;  %v1646_v53 = vpop.trf.xlu1 }
 0x99e   : > { %v1647_v58 = vpop.trf.xlu1 }
 0x9a2   : > { %v1648_v59 = vpop.trf.xlu1 }
 0x9a5   : > { %v2429_v54 = vpop.eup %2428 }
 0x9a6   : > { %v1624_v57 = vmul.f32 %v2429_v54, %v2425_v39  ;;  %v1649_v60 = vpop.trf.xlu1 }
 0x9a7   : > { %v2431_v55 = vpop.eup %2430 }
 0x9a8   : > { %v1626_v56 = vmul.f32 %v2431_v55, %v2427_v42 }
 0x9aa   : > { %1705 = vmatprep.subr.mxu0 %v1626_v56 }
 0x9ab   : > { %1706 = vmatpush1.msra.mxu0 %v1624_v57 }
 0x9ac   : > { %2104 = vmatmul.mubr.msk.f32.vlgmr.msra.gmra.mxu0 %vm1662_vm3, %v1646_v53 }
 0x9ad   : > { %1745 = vmatprep.mubr.f32.mxu0 %v2707_v30 }
 0x9b0   : > { %2105 = vmatmul.mubr.msk.f32.gmra.mxu0 %vm1662_vm3, %v1647_v58 }
 0x9b1   : > { %1751 = vmatprep.mubr.f32.mxu0 %v2707_v30 }
 0x9b4   : > { %2106 = vmatmul.mubr.msk.f32.gmra.mxu0 %vm1662_vm3, %v1648_v59 }
 0x9b5   : > { %1757 = vmatprep.mubr.f32.mxu0 %v2707_v30 }
 0x9b8   : > { %2107 = vmatmul.mubr.msk.f32.gmra.mxu0 %vm1662_vm3, %v1649_v60 }
 0xa6c   : > { %v1741_v61 = vpop.f32.mrf.mxu0 }
 0xa6e   : > { %v1743_v62 = vpop.f32.mrf.mxu0 }
 0xa70   : > { %v1747_v63 = vpop.f32.mrf.mxu0 }
 0xa72   : > { %v1749_v0 = vpop.f32.mrf.mxu0 }
 0xa74   : > { %v1753_v1 = vpop.f32.mrf.mxu0 }
 0xa76   : > { %v1755_v2 = vpop.f32.mrf.mxu0 }
 0xa78   : > { %v1759_v3 = vpop.f32.mrf.mxu0 }
 0xa7a   : > { %v1761_v4 = vpop.f32.mrf.mxu0 }
 0xa7b   : > { %1804 = vmatprep.subr.mxu1 %v1761_v4 }
 0xa7c   : > { %1805 = vmatpush1.msra.mxu1 %v1759_v3 }
 0xa7d   : > { %1806 = vmatprep.subr.mxu1 %v1755_v2 }
 0xa7e   : > { %1807 = vmatpush1.msra.mxu1 %v1753_v1 }
 0xa7f   : > { %1808 = vmatprep.subr.mxu1 %v1749_v0 }
 0xa80   : > { %1809 = vmatpush1.msra.mxu1 %v1747_v63 }
 0xa81   : > { %1810 = vmatprep.subr.mxu1 %v1743_v62 }
 0xa82   : > { %1811 = vmatpush1.msra.mxu1 %v1741_v61 }
 0xa83   : > { %2108 = vmatmul.mubr.msk.f32.vlgmr.msra.gmra.mxu1 %vm930_vm2, %v1764_v5 }
 0xa84   : > { %1850 = vmatprep.mubr.f32.mxu1 %v2707_v30 }
 0xa87   : > { %2109 = vmatmul.mubr.msk.f32.gmra.mxu1 %vm930_vm2, %v1765_v6 }
 0xa88   : > { %1856 = vmatprep.mubr.f32.mxu1 %v2707_v30 }
 0xa8b   : > { %2110 = vmatmul.mubr.msk.f32.gmra.mxu1 %vm930_vm2, %v1766_v7 }
 0xa8c   : > { %1862 = vmatprep.mubr.f32.mxu1 %v2707_v30 }
 0xa8f   : > { %2111 = vmatmul.mubr.msk.f32.gmra.mxu1 %vm930_vm2, %v1767_v8 }
 0xb43   : > { %v1846_v10 = vpop.f32.mrf.mxu1 }
 0xb44   : > { %v1877_v12 = vadd.f32 %v1869_v9, %v1846_v10 }
 0xb45   : > { %v1848_v13 = vpop.f32.mrf.mxu1 }
 0xb46   : > { %1885 = vst [vmem:[%s2961_s26] sm:$0xff] %v1877_v12  ;;  %v1878_v15 = vadd.f32 %v1870_v11, %v1848_v13 }
 0xb47   : > { %v1852_v16 = vpop.f32.mrf.mxu1 }
 0xb48   : > { %1886 = vst [vmem:[%s2961_s26 + $0x8] sm:$0xff] %v1878_v15  ;;  %v1879_v30 = vadd.f32 %v1871_v14, %v1852_v16 }
 0xb49   : > { %v1854_v18 = vpop.f32.mrf.mxu1 }
 0xb4a   : > { %1887 = vst [vmem:[%s2961_s26 + $0x10] sm:$0xff] %v1879_v30  ;;  %v1880_v20 = vadd.f32 %v1872_v17, %v1854_v18 }
 0xb4b   : > { %v1858_v21 = vpop.f32.mrf.mxu1 }
 0xb4c   : > { %1888 = vst [vmem:[%s2961_s26 + $0x18] sm:$0xff] %v1880_v20  ;;  %v1881_v23 = vadd.f32 %v1873_v19, %v1858_v21 }
 0xb4d   : > { %v1860_v24 = vpop.f32.mrf.mxu1 }
 0xb4e   : > { %1889 = vst [vmem:[%s2961_s26 + $0x20] sm:$0xff] %v1881_v23  ;;  %v1882_v26 = vadd.f32 %v1874_v22, %v1860_v24 }
 0xb4f   : > { %v1864_v27 = vpop.f32.mrf.mxu1 }
 0xb50   : > { %1890 = vst [vmem:[%s2961_s26 + $0x28] sm:$0xff] %v1882_v26  ;;  %v1883_v29 = vadd.f32 %v1875_v25, %v1864_v27 }
 0xb51   : > { %v1866_v31 = vpop.f32.mrf.mxu1 }
 0xb52   : > { %1891 = vst [vmem:[%s2961_s26 + $0x30] sm:$0xff] %v1883_v29  ;;  %v1884_v32 = vadd.f32 %v1876_v28, %v1866_v31 }
 0xb54   : > { %1892 = vst [vmem:[%s2961_s26 + $0x38] sm:$0xff] %v1884_v32 }
 0xb55   : > { %2601 = shalt.err (!%p2598_p8)
}
 0xb56   : > { %s2602_s22 = scalar_lea.hbm %s3215_s25, 1024  ;;  %s2606_s19 = scalar_lea.hbm %s3285_s11, 4096 }
 0xb57   : > { %p2603_p9 = scmp.ne.s32.totalorder %s3215_s25, %s2602_s22  ;;  %p2607_p10 = scmp.lt.s32.totalorder %s3215_s25, %s3285_s11 }
 0xb58   : > { %p2608_p0 = scmp.lt.s32.totalorder %s2606_s19, %s2602_s22 }
 0xb59   : > { %p2604_p7 = pnand %p2603_p9, %p2825_p3 }
 0xb5a   : > { %p2609_p12 = por %p2608_p0, %p2607_p10 }
 0xb5b   : > { %p2605_p11 = pneg %p2604_p7 }
 0xb5d   : > { %p2610_p1 = pnand %p2609_p12, %p2605_p11 }
 0xb5f   : > { %2613 = shalt.err (!%p2610_p1)
}
 0xb60   : > { %s2711_s15 = smov 256   ;;  %s2712_s20 = smov 16  }
 0xb61   : > { %2302 = dma.vmem_to_hbm [thread:$0]  (%p2825_p3), %s3217_s21, 1024, %s3215_s25, %s3223_s28, %s2711_s15, %s2711_s15, %s2712_s20  }
 0xb62 PF: > { %s3309_s23 = sld [smem:[#allocation21_spill]]  ;;  %p2339_p13 = scmp.ge.s32.totalorder %s2696_s24, 2 }
 0xb63   : > { %s3310_s17 = sld [smem:[#allocation27_spill]] }
 0xb68   : > { %s1924_s27 = sand.u32 1, %s3309_s23  }
 0xb69   : > { %p3311_p4 = scmp.ne.s32.totalorder %s3310_s17, 0  ;;  %s1925_s29 = scalar_lea.sflag [#allocation6], %s1924_s27 }
 0xb6b   : > { %p2324_p2 = pnand %p2339_p13, %p3311_p4 }
 0xb6d   : > { %p2325_p5 = pneg %p2324_p2 }
 0xb6f   : > { %2663 = dma.done.wait (%p2325_p5), %s1925_s29, 1024  }
 0xb70   : > { %2665 = vsyncadd (%p2325_p5), %s1925_s29, 4294966272  ;;  %s28_s24 = sadd.s32 1, %s2696_s24   ;;  %s3312_s14 = sld [smem:[#allocation22_spill]] }
 0xb71   : > { %p25_p6 = scmp.ge.s32.totalorder %s28_s24, 6   ;;  %s3313_s19 = sld [smem:[#allocation28_spill]] }
 0xb72   : > { %s3314_s20 = sld [smem:[#allocation23_spill]]  ;;  %s3318_s17 = smov %s2672_s18 }
 0xb73   : > { %s3315_s21 = sld [smem:[#allocation24_spill]]  ;;  %27 = sbr.rel (!%p25_p6) target bundleno = 11 (0xb), region = 131 }
 0xb74   : > { %s3316_s22 = sld [smem:[#allocation25_spill]] }
 0xb75   : > { %s3317_s23 = sld [smem:[#allocation26_spill]] }
 0xb76   : > { %s3319_s18 = smov %s3312_s14 }
 0xb78   :  { %1930 = vsyncpa [#allocation5], 1 }
 0xb79   :  { %1932 = vsyncpa [#allocation5 + $0x1], 1 }
 0xb7a   :  { %1933 = vsyncpa [#allocation8], 1 }
 0xb7b   :  { %1934 = vsyncpa [#allocation11], 1 }
 0xb7c   :  { %1935 = vsyncpa [#allocation14], 1 }
 0xb7d   :  { %1936 = vsyncpa [#allocation6], 1 }
 0xb7e   :  { %1938 = vsyncpa [#allocation6 + $0x1], 1 }

</bundles_post_ra>
